<compile_context>
chip_gen: v6e
topology: v6e:2x2x1
jax: 0.10.0
libtpu: 0.0.40
codegen_flags: <defaults>
</compile_context>

<pallas_src>
import jax
import jax.numpy as jnp
from jax import lax
from jax.experimental import pallas as pl
from jax.experimental.pallas import tpu as pltpu


# Padded (lane-dense) layer widths; true widths are 330, 288, 102, 10.
D_IN = 784
H0, H1, H2, H3 = 384, 384, 128, 128
N_CLASSES = 10


# ---------------------------------------------------------------------------
# Kernel: four bf16 MXU matmuls (f32 accum) + tanh + masked log-softmax.
# ---------------------------------------------------------------------------
def net_kernel(x_ref, w0_ref, b0_ref, w2_ref, w4_ref, w6_ref, o_ref):
    f32 = jnp.float32
    bf16 = jnp.bfloat16

    x = x_ref[...]                                                    # (TB, 784) bf16
    # Bias add / tanh kept in f32 (v5e VPU/EUP have no bf16 fast path);
    # only the dot operands are bf16.
    h = jnp.tanh(jnp.dot(x, w0_ref[...], preferred_element_type=f32)
                 + b0_ref[...])                                       # (TB, 384) f32
    h = jnp.tanh(jnp.dot(h.astype(bf16), w2_ref[...],
                         preferred_element_type=f32))                 # (TB, 384) f32
    h = jnp.tanh(jnp.dot(h.astype(bf16), w4_ref[...],
                         preferred_element_type=f32))                 # (TB, 128) f32
    logits = jnp.dot(h.astype(bf16), w6_ref[...],
                     preferred_element_type=f32)                      # (TB, 128) f32

    # Mask the 118 padded class lanes to -inf-ish before the reductions so the
    # log-softmax normalizer only sees the 10 real classes.
    lane = lax.broadcasted_iota(jnp.int32, logits.shape, 1)
    logits = jnp.where(lane < N_CLASSES, logits, -1e30)
    m = jnp.max(logits, axis=-1, keepdims=True)
    lse = m + jnp.log(jnp.sum(jnp.exp(logits - m), axis=-1, keepdims=True))
    o_ref[...] = logits - lse                                         # (TB, 128) lane-dense


# ---------------------------------------------------------------------------
# Wrapper helpers
# ---------------------------------------------------------------------------
def conv_toeplitz(w, L_in):
    """PyTorch Conv1d weight (C_out, C_in, K) -> dense (C_in*L_in, C_out*L_out)
    matrix acting on activations flattened in (C, L) order (PyTorch layout):
        out_flat = in_flat @ W,  out_flat[c_out*L_out + p] matches Conv1d."""
    C_out, C_in, K = w.shape
    L_out = L_in - K + 1
    l = jnp.arange(L_in)[:, None, None]            # (L_in, 1, 1)
    p = jnp.arange(L_out)[None, :, None]           # (1, L_out, 1)
    k = jnp.arange(K)[None, None, :]               # (1, 1, K)
    sel = (l == p + k).astype(jnp.float32)         # (L_in, L_out, K)
    W = jnp.einsum('oik,lpk->ilop', w.astype(jnp.float32), sel)
    return W.reshape(C_in * L_in, C_out * L_out)


def _pad2d(a, rows, cols):
    return jnp.pad(a, ((0, rows - a.shape[0]), (0, cols - a.shape[1])))


def conv1dtanh_15_forward(x, params, *, tb=1024):
    """x: (B, ...) with 784 trailing elements (PyTorch view semantics)."""
    w0, b0, w2, w4, w6 = params
    B = x.shape[0]
    x2 = x.reshape(B, D_IN).astype(jnp.bfloat16)   # (C=16, L=49) flattened, bf16

    # Dense block-Toeplitz conv matrices, zero-padded to lane-dense widths.
    # Padded rows/cols are zero, so padded hidden lanes carry tanh(0)=0 and
    # contribute nothing downstream -> results are exact.
    W0 = _pad2d(conv_toeplitz(w0, 49), D_IN, H0).astype(jnp.bfloat16)   # (784, 384)
    W2 = _pad2d(conv_toeplitz(w2, 10), H0, H1).astype(jnp.bfloat16)     # (384, 384)
    W4 = _pad2d(conv_toeplitz(w4, 8), H1, H2).astype(jnp.bfloat16)      # (384, 128)
    W6 = _pad2d(conv_toeplitz(w6, 3), H2, H3).astype(jnp.bfloat16)      # (128, 128)
    b0f = _pad2d(jnp.repeat(b0.astype(jnp.float32), 10).reshape(1, 330),
                 1, H0)                                                 # (1, 384) f32

    # Batch tiling: >= 2 grid steps so v7x's two TensorCores both get work
    # under dimension_semantics=("parallel",); TB rounded to a multiple of 16
    # (bf16 sublane packing).
    num_steps = max(2, pl.cdiv(B, tb))
    TB = ((pl.cdiv(B, num_steps) + 15) // 16) * 16
    Bp = num_steps * TB
    if Bp != B:
        x2 = jnp.pad(x2, ((0, Bp - B), (0, 0)))

    full = lambda shape: pl.BlockSpec(shape, lambda b: (0,) * len(shape))

    layer_flops = D_IN * H0 + H0 * H1 + H1 * H2 + H2 * H3
    cost = pl.CostEstimate(
        flops=2 * Bp * layer_flops,
        transcendentals=Bp * (H0 + H1 + H2 + H3),           # tanh x3 + exp
        bytes_accessed=(Bp * D_IN * 2                        # bf16 input stream
                        + layer_flops * 2 + H0 * 4           # resident weights
                        + Bp * H3 * 4),                      # f32 output slab
    )

    out = pl.pallas_call(
        net_kernel,
        out_shape=jax.ShapeDtypeStruct((Bp, H3), jnp.float32),
        grid=(num_steps,),
        in_specs=[
            pl.BlockSpec((TB, D_IN), lambda b: (b, 0)),
            full((D_IN, H0)),
            full((1, H0)),
            full((H0, H1)),
            full((H1, H2)),
            full((H2, H3)),
        ],
        out_specs=pl.BlockSpec((TB, H3), lambda b: (b, 0)),
        compiler_params=pltpu.CompilerParams(
            dimension_semantics=("parallel",)),
        cost_estimate=cost,
    )(x2, W0, b0f, W2, W4, W6)
    return out[:B, :N_CLASSES]


# ---------------------------------------------------------------------------
# Deterministic parameter init (PyTorch-style uniform bounds)
# ---------------------------------------------------------------------------
def init_params(key):
    def uni(k, shape, fan_in):
        bound = 1.0 / jnp.sqrt(jnp.float32(fan_in))
        return jax.random.uniform(k, shape, jnp.float32, -bound, bound)

    k = jax.random.split(key, 5)
    w0 = uni(k[0], (33, 16, 40), 16 * 40)
    b0 = uni(k[1], (33,), 16 * 40)
    w2 = uni(k[2], (36, 33, 3), 33 * 3)
    w4 = uni(k[3], (34, 36, 6), 36 * 6)
    w6 = uni(k[4], (10, 34, 3), 34 * 3)
    return (w0, b0, w2, w4, w6)


# ---------------------------------------------------------------------------
# Pure-JAX f32 reference (for correctness check)
# ---------------------------------------------------------------------------
def reference_forward(x, params):
    w0, b0, w2, w4, w6 = params
    B = x.shape[0]
    h = x.reshape(B, 16, 49).astype(jnp.float32)
    dn = ("NCH", "OIH", "NCH")
    conv = lambda a, w: lax.conv_general_dilated(a, w, (1,), "VALID",
                                                 dimension_numbers=dn)
    h = jnp.tanh(conv(h, w0) + b0[None, :, None])
    h = jnp.tanh(conv(h, w2))
    h = jnp.tanh(conv(h, w4))
    h = conv(h, w6).reshape(B, 10)
    return jax.nn.log_softmax(h, axis=1)


if __name__ == "__main__":
    key = jax.random.PRNGKey(0)
    kx, kp = jax.random.split(key)
    x = jax.random.normal(kx, (2, 1, 28, 28), jnp.float32)   # 1*28*28 = 16*49
    params = init_params(kp)

    out = conv1dtanh_15_forward(x, params)
    out = jax.block_until_ready(out)

    ref = jax.block_until_ready(reference_forward(x, params))
    assert out.shape == (2, 10)
    # bf16 MXU operands (f32 accumulation) -> loosened tolerance vs f32 ref.
    assert jnp.allclose(out, ref, atol=5e-2, rtol=5e-2), "mismatch vs reference"

    print("KERNEL_OK")
</pallas_src>

<mosaic_0001>
module attributes {stable_mosaic.version = 11 : i64} {
  func.func @net_kernel(%arg0: i32, %arg1: memref<16x784xbf16, #tpu.memory_space<vmem>>, %arg2: memref<784x384xbf16, #tpu.memory_space<vmem>>, %arg3: memref<1x384xf32, #tpu.memory_space<vmem>>, %arg4: memref<384x384xbf16, #tpu.memory_space<vmem>>, %arg5: memref<384x128xbf16, #tpu.memory_space<vmem>>, %arg6: memref<128x128xbf16, #tpu.memory_space<vmem>>, %arg7: memref<16x128xf32, #tpu.memory_space<vmem>>) attributes {dimension_semantics = [#tpu.dimension_semantics<parallel>], iteration_bounds = array<i64: 2>, scalar_prefetch = 0 : i64, scratch_operands = 0 : i64, tpu.core_type = #tpu.core_type<tc>, window_params = [{transform_indices = @transform_0, window_bounds = array<i64: 16, 784>}, {pipeline_mode = #tpu.pipeline_mode<synchronous>, transform_indices = @transform_1, window_bounds = array<i64: 784, 384>}, {pipeline_mode = #tpu.pipeline_mode<synchronous>, transform_indices = @transform_2, window_bounds = array<i64: 1, 384>}, {pipeline_mode = #tpu.pipeline_mode<synchronous>, transform_indices = @transform_3, window_bounds = array<i64: 384, 384>}, {pipeline_mode = #tpu.pipeline_mode<synchronous>, transform_indices = @transform_4, window_bounds = array<i64: 384, 128>}, {pipeline_mode = #tpu.pipeline_mode<synchronous>, transform_indices = @transform_5, window_bounds = array<i64: 128, 128>}, {transform_indices = @transform_6, window_bounds = array<i64: 16, 128>}]} {
    %c0 = arith.constant 0 : index
    %c0_0 = arith.constant 0 : index
    %0 = vector.load %arg1[%c0, %c0_0] : memref<16x784xbf16, #tpu.memory_space<vmem>>, vector<16x784xbf16>
    %c0_1 = arith.constant 0 : index
    %c0_2 = arith.constant 0 : index
    %1 = vector.load %arg2[%c0_1, %c0_2] : memref<784x384xbf16, #tpu.memory_space<vmem>>, vector<784x384xbf16>
    %cst = arith.constant dense<0.000000e+00> : vector<16x384xf32>
    %2 = tpu.matmul %0, %1, %cst {dimension_numbers = #tpu.dot_dimension_numbers<[1], [0], [0], [1], [0, 0, 1, 1], [], []>} : vector<16x784xbf16>, vector<784x384xbf16>, vector<16x384xf32> -> vector<16x384xf32>
    %c0_3 = arith.constant 0 : index
    %c0_4 = arith.constant 0 : index
    %3 = vector.load %arg3[%c0_3, %c0_4] : memref<1x384xf32, #tpu.memory_space<vmem>>, vector<1x384xf32>
    %4 = vector.broadcast %3 : vector<1x384xf32> to vector<16x384xf32>
    %5 = arith.addf %2, %4 : vector<16x384xf32>
    %6 = math.tanh %5 : vector<16x384xf32>
    %7 = arith.truncf %6 : vector<16x384xf32> to vector<16x384xbf16>
    %c0_5 = arith.constant 0 : index
    %c0_6 = arith.constant 0 : index
    %8 = vector.load %arg4[%c0_5, %c0_6] : memref<384x384xbf16, #tpu.memory_space<vmem>>, vector<384x384xbf16>
    %cst_7 = arith.constant dense<0.000000e+00> : vector<16x384xf32>
    %9 = tpu.matmul %7, %8, %cst_7 {dimension_numbers = #tpu.dot_dimension_numbers<[1], [0], [0], [1], [0, 0, 1, 1], [], []>} : vector<16x384xbf16>, vector<384x384xbf16>, vector<16x384xf32> -> vector<16x384xf32>
    %10 = math.tanh %9 : vector<16x384xf32>
    %11 = arith.truncf %10 : vector<16x384xf32> to vector<16x384xbf16>
    %c0_8 = arith.constant 0 : index
    %c0_9 = arith.constant 0 : index
    %12 = vector.load %arg5[%c0_8, %c0_9] : memref<384x128xbf16, #tpu.memory_space<vmem>>, vector<384x128xbf16>
    %cst_10 = arith.constant dense<0.000000e+00> : vector<16x128xf32>
    %13 = tpu.matmul %11, %12, %cst_10 {dimension_numbers = #tpu.dot_dimension_numbers<[1], [0], [0], [1], [0, 0, 1, 1], [], []>} : vector<16x384xbf16>, vector<384x128xbf16>, vector<16x128xf32> -> vector<16x128xf32>
    %14 = math.tanh %13 : vector<16x128xf32>
    %15 = arith.truncf %14 : vector<16x128xf32> to vector<16x128xbf16>
    %c0_11 = arith.constant 0 : index
    %c0_12 = arith.constant 0 : index
    %16 = vector.load %arg6[%c0_11, %c0_12] : memref<128x128xbf16, #tpu.memory_space<vmem>>, vector<128x128xbf16>
    %cst_13 = arith.constant dense<0.000000e+00> : vector<16x128xf32>
    %17 = tpu.matmul %15, %16, %cst_13 {dimension_numbers = #tpu.dot_dimension_numbers<[1], [0], [0], [1], [0, 0, 1, 1], [], []>} : vector<16x128xbf16>, vector<128x128xbf16>, vector<16x128xf32> -> vector<16x128xf32>
    %18 = tpu.iota {dimensions = array<i32: 1>} : vector<16x128xi32>
    %c10_i32 = arith.constant 10 : i32
    %19 = vector.broadcast %c10_i32 : i32 to vector<16x128xi32>
    %20 = arith.cmpi slt, %18, %19 : vector<16x128xi32>
    %cst_14 = arith.constant -1.000000e+30 : f32
    %21 = vector.broadcast %cst_14 : f32 to vector<16x128xf32>
    %22 = arith.select %20, %17, %21 : vector<16x128xi1>, vector<16x128xf32>
    %cst_15 = arith.constant dense<0xFF800000> : vector<16xf32>
    %23 = vector.multi_reduction <maximumf>, %22, %cst_15 [1] : vector<16x128xf32> to vector<16xf32>
    %24 = vector.shape_cast %23 : vector<16xf32> to vector<16x1xf32>
    %25 = vector.broadcast %24 : vector<16x1xf32> to vector<16x128xf32>
    %26 = arith.subf %22, %25 : vector<16x128xf32>
    %27 = math.exp %26 : vector<16x128xf32>
    %cst_16 = arith.constant dense<0.000000e+00> : vector<16xf32>
    %28 = vector.multi_reduction <add>, %27, %cst_16 [1] : vector<16x128xf32> to vector<16xf32>
    %29 = vector.shape_cast %28 : vector<16xf32> to vector<16x1xf32>
    %30 = math.log %29 : vector<16x1xf32>
    %31 = arith.addf %24, %30 : vector<16x1xf32>
    %32 = vector.broadcast %31 : vector<16x1xf32> to vector<16x128xf32>
    %33 = arith.subf %22, %32 : vector<16x128xf32>
    %c0_17 = arith.constant 0 : index
    %c0_18 = arith.constant 0 : index
    %34 = vector.load %arg7[%c0_17, %c0_18] : memref<16x128xf32, #tpu.memory_space<vmem>>, vector<16x128xf32>
    tpu.vector_store %arg7[%c0_17, %c0_18], %33 {strides = array<i32>} : memref<16x128xf32, #tpu.memory_space<vmem>>, vector<16x128xf32>,
    return
  }
  func.func @transform_0(%arg0: i32) -> (i32, i32) {
    %c0_i32 = arith.constant 0 : i32
    %c0_i32_0 = arith.constant 0 : i32
    return %arg0, %c0_i32 : i32, i32
  }
  func.func @transform_1(%arg0: i32) -> (i32, i32) {
    %c0_i32 = arith.constant 0 : i32
    %c0_i32_0 = arith.constant 0 : i32
    %c0_i32_1 = arith.constant 0 : i32
    return %c0_i32, %c0_i32_0 : i32, i32
  }
  func.func @transform_2(%arg0: i32) -> (i32, i32) {
    %c0_i32 = arith.constant 0 : i32
    %c0_i32_0 = arith.constant 0 : i32
    %c0_i32_1 = arith.constant 0 : i32
    return %c0_i32, %c0_i32_0 : i32, i32
  }
  func.func @transform_3(%arg0: i32) -> (i32, i32) {
    %c0_i32 = arith.constant 0 : i32
    %c0_i32_0 = arith.constant 0 : i32
    %c0_i32_1 = arith.constant 0 : i32
    return %c0_i32, %c0_i32_0 : i32, i32
  }
  func.func @transform_4(%arg0: i32) -> (i32, i32) {
    %c0_i32 = arith.constant 0 : i32
    %c0_i32_0 = arith.constant 0 : i32
    %c0_i32_1 = arith.constant 0 : i32
    return %c0_i32, %c0_i32_0 : i32, i32
  }
  func.func @transform_5(%arg0: i32) -> (i32, i32) {
    %c0_i32 = arith.constant 0 : i32
    %c0_i32_0 = arith.constant 0 : i32
    %c0_i32_1 = arith.constant 0 : i32
    return %c0_i32, %c0_i32_0 : i32, i32
  }
  func.func @transform_6(%arg0: i32) -> (i32, i32) {
    %c0_i32 = arith.constant 0 : i32
    %c0_i32_0 = arith.constant 0 : i32
    return %arg0, %c0_i32 : i32, i32
  }
}

</mosaic_0001>

<bundles_post_ra>
// kernel: tpu_custom_call.1
= control target key start
LH: loop header
LB: loop body
LE: loop exit
PB: predicated region body
PF: predicated region fallthrough
CT: control target
= control target key end

     0   :  { %11 = vsyncpa [#allocation3], 0  ;;  %s4434_s0 = inlined_call_operand.hbm [shape: bf16[32,784], index: 0, kind: input, shape index: {}]   ;;  %s4435_s1 = inlined_call_operand.hbm [shape: bf16[784,384], index: 1, kind: input, shape index: {}]   ;;  %s4436_s2 = inlined_call_operand.vmem [shape: f32[1,384], index: 2, kind: input, shape index: {}]   ;;  %s4437_s3 = inlined_call_operand.hbm [shape: bf16[384,384], index: 3, kind: input, shape index: {}]   ;;  %s4438_s4 = inlined_call_operand.hbm [shape: bf16[384,128], index: 4, kind: input, shape index: {}]   ;;  %s4439_s5 = inlined_call_operand.hbm [shape: bf16[128,128], index: 5, kind: input, shape index: {}]   ;;  %s4440_s6 = inlined_call_operand.hbm [shape: f32[32,128], index: 6, kind: output, shape index: {}]  }
   0x1   :  { %13 = vsyncpa [#allocation3 + $0x1], 0 }
   0x2   :  { %14 = vsyncpa [#allocation6], 0 }
   0x3   :  { %15 = vsyncpa [#allocation9], 0 }
   0x4   :  { %16 = vsyncpa [#allocation4], 0 }
   0x5   :  { %18 = vsyncpa [#allocation4 + $0x1], 0  ;;  %s4130_s21 = smov 0   ;;  %s4132_s22 = smov 0  }
   0x6   :  { %s4134_s23 = smov 0   ;;  %s4136_s24 = smov 0  }
   0x7 LB: > { %s4151_s25 = sadd.s32 4294967295, %s4076_s24   ;;  %s2914_s26 = sadd.s32 4294967294, %s4076_s24   ;;  %s4076_s24 = sphi %s4136_s24, %s4464_s24   ;;  %s4072_s23 = sphi %s4134_s23, %s4463_s23   ;;  %s4068_s22 = sphi %s4132_s22, %s4462_s22   ;;  %s4064_s21 = sphi %s4130_s21, %s4461_s21  }
   0x8   : > { %p44_p0 = scmp.ne.s32.totalorder %s4068_s22, %s4064_s21  ;;  %p4441_p1 = scmp.eq.s32.totalorder %s4151_s25, 0 }
   0x9   : > { %p179_p3 = scmp.eq.s32.totalorder %s2914_s26, 1  ;;  %p2915_p5 = scmp.ge.s32.totalorder %s4076_s24, 1 }
   0xa   : > { %p4160_p4 = por %p4441_p1, %p44_p0  ;;  %p186_p7 = scmp.lt.s32.totalorder %s4076_s24, 3 }
   0xb   : > { %p4165_p6 = por %p179_p3, %p44_p0  ;;  %s4078_s30 = smov [#allocation5]  }
   0xc   : > { %s4445_s27 = scalar_select %p4160_p4, 1, 0 }
   0xd   : > { %s4446_s28 = scalar_select %p4165_p6, 1, 0 }
   0xe   : > { %p4170_p8 = pnand %p2915_p5, %p186_p7  ;;  %s198_s7 = sshll.u32 %s4078_s30, 4  ;;  %s199_s7 = int_to_ptr.vmem [resolvable:$true] %s198_s7 }
   0xf   : > { %s4079_s9 = smov [#allocation8]   ;;  %s3883_s11 = scalar_lea.vmem %s199_s7, 18816 }
  0x10   : > { %s4447_s29 = scalar_select %p4170_p8, 1, 0 }
  0x11   : > { %p3424_p9 = pneg %p4170_p8  ;;  %s227_s10 = sshll.u32 %s4079_s9, 4  ;;  %s228_s10 = int_to_ptr.vmem [resolvable:$true] %s227_s10 }
  0x12   : > { %p3884_p13 = scmp.ne.s32.totalorder %s199_s7, %s3883_s11  ;;  %p3891_p5 = scmp.lt.s32.totalorder %s199_s7, %s199_s7 }
  0x13   : > { %p4179_p11 = pnand %p3424_p9, %p4441_p1  ;;  %p3892_p7 = scmp.lt.s32.totalorder %s3883_s11, %s3883_s11 }
  0x15   : > { %p3874_p12 = pneg %p4179_p11  ;;  %p3893_p10 = por %p3892_p7, %p3891_p5 }
  0x17   : > { %p3886_p0 = pnand %p3884_p13, %p3874_p12 }
  0x19   : > { %p3887_p3 = pneg %p3886_p0 }
  0x1b   : > { %p3894_p9 = pnand %p3893_p10, %p3887_p3 }
  0x1d   : > { %3897 = shalt.err (!%p3894_p9)
}
  0x1e   : > { %s4080_s12 = smov 192   ;;  %s4081_s13 = smov 12  }
  0x1f   : > { %3427 = dma.hbm_to_vmem [thread:$0]  (!%p4179_p11), %s4435_s1, 18816, %s199_s7, [#allocation6], %s4080_s12, %s4080_s12, %s4081_s13  }
  0x20   : > { %s3909_s16 = scalar_lea.vmem %s228_s10, 3072  ;;  %p3917_p10 = scmp.lt.s32.totalorder %s228_s10, %s228_s10 }
  0x21   : > { %p3910_p13 = scmp.ne.s32.totalorder %s228_s10, %s3909_s16  ;;  %p3918_p3 = scmp.lt.s32.totalorder %s3909_s16, %s3909_s16 }
  0x23   : > { %p3912_p0 = pnand %p3910_p13, %p3874_p12  ;;  %p3919_p7 = por %p3918_p3, %p3917_p10 }
  0x25   : > { %p3913_p5 = pneg %p3912_p0 }
  0x27   : > { %p3920_p9 = pnand %p3919_p7, %p3913_p5 }
  0x29   : > { %3923 = shalt.err (!%p3920_p9)
}
  0x2a   : > { %s4082_s17 = smov 64   ;;  %s4083_s18 = smov 4  }
  0x2b   : > { %3433 = dma.hbm_to_vmem [thread:$0]  (!%p4179_p11), %s4438_s4, 3072, %s228_s10, [#allocation9], %s4082_s17, %s4082_s17, %s4083_s18  }
  0x2c   : > { %s4084_s26 = smov [#allocation7]   ;;  %s4085_s7 = smov [#allocation10]  }
  0x2d   : > { %s214_s30 = sshll.u32 %s4084_s26, 4  ;;  %s240_s9 = sshll.u32 %s4085_s7, 4  ;;  %s215_s30 = int_to_ptr.vmem [resolvable:$true] %s214_s30  ;;  %s241_s9 = int_to_ptr.vmem [resolvable:$true] %s240_s9 }
  0x2e   : > { %s3935_s11 = scalar_lea.vmem %s215_s30, 9216  ;;  %p3943_p10 = scmp.lt.s32.totalorder %s215_s30, %s215_s30 }
  0x2f   : > { %p3936_p13 = scmp.ne.s32.totalorder %s215_s30, %s3935_s11  ;;  %p3944_p3 = scmp.lt.s32.totalorder %s3935_s11, %s3935_s11 }
  0x31   : > { %p3938_p0 = pnand %p3936_p13, %p3874_p12  ;;  %p3945_p7 = por %p3944_p3, %p3943_p10 }
  0x33   : > { %p3939_p5 = pneg %p3938_p0 }
  0x35   : > { %p3946_p9 = pnand %p3945_p7, %p3939_p5 }
  0x37   : > { %3949 = shalt.err (!%p3946_p9)
}
  0x38   : > { %3430 = dma.hbm_to_vmem [thread:$0]  (!%p4179_p11), %s4437_s3, 9216, %s215_s30, [#allocation6], %s4080_s12, %s4080_s12, %s4081_s13  }
  0x39   : > { %s3961_s15 = scalar_lea.vmem %s241_s9, 1024  ;;  %p3969_p2 = scmp.lt.s32.totalorder %s241_s9, %s241_s9 }
  0x3a   : > { %p3962_p1 = scmp.ne.s32.totalorder %s241_s9, %s3961_s15  ;;  %p3970_p10 = scmp.lt.s32.totalorder %s3961_s15, %s3961_s15 }
  0x3c   : > { %p3964_p13 = pnand %p3962_p1, %p3874_p12  ;;  %p3971_p5 = por %p3970_p10, %p3969_p2 }
  0x3e   : > { %p3965_p0 = pneg %p3964_p13 }
  0x40   : > { %p3972_p3 = pnand %p3971_p5, %p3965_p0 }
  0x42   : > { %3975 = shalt.err (!%p3972_p3)
}
  0x43   : > { %3436 = dma.hbm_to_vmem [thread:$0]  (!%p4179_p11), %s4439_s5, 1024, %s241_s9, [#allocation9], %s4082_s17, %s4082_s17, %s4083_s18  }
  0x44   : > { %s4230_s12 = sadd.s32 1, %s4076_s24   ;;  %s31_s13 = sadd.s32 1, %s4072_s23 }
  0x45   : > { %s28_s8 = ssub.s32 %s4076_s24, %s4230_s12  ;;  %p38_p2 = scmp.ne.s32.totalorder %s4072_s23, %s4068_s22 }
  0x46   : > { %p29_p1 = scmp.eq.s32.totalorder %s28_s8, 0  ;;  %p39_p12 = scmp.eq.s32.totalorder %s4076_s24, 0 }
  0x47   : > { %p4449_p9 = scmp.eq.s32.totalorder %s4151_s25, 1  ;;  %p3449_p0 = scmp.lt.s32.totalorder %s4076_s24, 2 }
  0x48   : > { %s4239_s20 = scalar_select %p29_p1, %s4072_s23, %s31_s13  }
  0x49   : > { %p40_p7 = por %p39_p12, %p38_p2  ;;  %p4243_p13 = por %p4449_p9, %p38_p2 }
  0x4a   : > { %s254_s30 = sand.u32 1, %s4072_s23   ;;  %s3402_s17 = smul.u32 896, %s4076_s24 }
  0x4b   : > { %s4450_s26 = scalar_select %p4243_p13, 1, 0 }
  0x4c   : > { %s3401_s7 = smul.u32 56, %s254_s30  ;;  %p4250_p11 = pnand %p3449_p0, %p40_p7 }
  0x4d   : > { %s4257_s10 = scalar_lea.hbm %s4434_s0, %s3402_s17  ;;  %s4261_s16 = scalar_lea.sflag [#allocation3], %s254_s30 }
  0x4e   : > { %s258_s14 = scalar_lea.vmem [#allocation2], %s3401_s7  ;;  %s3976_s19 = scalar_lea.hbm %s4257_s10, 896 }
  0x4f   : > { %s266_s15 = sshll.u32 %s258_s14, 4  ;;  %p3977_p10 = scmp.ne.s32.totalorder %s4257_s10, %s3976_s19  ;;  %s4259_s15 = int_to_ptr.vmem [resolvable:$true] %s266_s15 }
  0x50   : > { %p3978_p5 = pneg %p4250_p11  ;;  %s3981_s17 = scalar_lea.hbm %s4434_s0, 1792 }
  0x51   : > { %p3982_p2 = scmp.lt.s32.totalorder %s4257_s10, %s4434_s0  ;;  %p3983_p12 = scmp.lt.s32.totalorder %s3981_s17, %s3976_s19 }
  0x52   : > { %p3979_p3 = pnand %p3978_p5, %p3977_p10 }
  0x53   : > { %p3984_p7 = por %p3983_p12, %p3982_p2 }
  0x54   : > { %p3980_p1 = pneg %p3979_p3 }
  0x56   : > { %p3985_p9 = pnand %p3984_p7, %p3980_p1 }
  0x58   : > { %3988 = shalt.err (!%p3985_p9)
}
  0x59   : > { %s3989_s30 = scalar_lea.vmem %s4259_s15, 896  ;;  %s4086_s7 = smov [#allocation2]  }
  0x5a   : > { %p3990_p0 = scmp.ne.s32.totalorder %s4259_s15, %s3989_s30  ;;  %s3994_s14 = sshll.u32 %s4086_s7, 4  ;;  %s3995_s14 = int_to_ptr.vmem [resolvable:$false] %s3994_s14 }
  0x5b   : > { %s3996_s8 = scalar_lea.vmem %s3995_s14, 1792  ;;  %p3997_p3 = scmp.lt.s32.totalorder %s4259_s15, %s3995_s14 }
  0x5c   : > { %p3992_p6 = pnand %p3990_p0, %p3978_p5  ;;  %p3998_p13 = scmp.lt.s32.totalorder %s3996_s8, %s3989_s30 }
  0x5e   : > { %p3993_p10 = pneg %p3992_p6  ;;  %p3999_p4 = por %p3998_p13, %p3997_p3 }
  0x60   : > { %p4000_p8 = pnand %p3999_p4, %p3993_p10 }
  0x62   : > { %4003 = shalt.err (!%p4000_p8)
}
  0x63   : > { %s4087_s19 = smov 448   ;;  %s4088_s13 = smov 28  }
  0x64   : > { %3440 = dma.hbm_to_vmem [thread:$0]  (!%p4250_p11), %s4257_s10, 896, %s4259_s15, %s4261_s16, %s4087_s19, %s4087_s19, %s4088_s13  }
  0x65   : > { %p4452_p5 = scmp.ne.s32.totalorder %s4447_s29, 0 }
  0x66   : > { %s4285_s17 = sand.u32 (!%p4452_p5), 1, %s4068_s22   ;;  %p4453_p4 = scmp.ne.s32.totalorder (!%p4452_p5), %s4445_s27, 0 }
  0x67   : > { %278 = sbr.rel (%p4452_p5) target bundleno = 1489 (0x5d1), region = 44  ;;  %s281_s11 = scalar_lea.sflag (!%p4452_p5), [#allocation3], %s4285_s17 }
  0x68   : > { %s3403_s9 = smul.u32 (!%p4452_p5), 56, %s4285_s17 }
  0x6a   : > { %s4289_s30 = scalar_lea.vmem (!%p4452_p5), [#allocation2], %s3403_s9 }
  0x6c   : > { %4047 = dma.done.wait (%p4453_p4), %s281_s11, 896  }
  0x6d   : > { %4049 = vsyncadd (%p4453_p4), %s281_s11, 4294966400  ;;  %p4454_p6 = scmp.eq.s32.totalorder %s4151_s25, 0 }
  0x6f   : > { %4051 = dma.done.wait (%p4454_p6), [#allocation6], 28032   ;;  %p4455_p8 = pmov %p4454_p6 }
  0x70   : > { %p4456_p13 = pmov %p4454_p6 }
  0x71   : > { %4053 = vsyncadd (%p4455_p8), [#allocation6], 4294939264 }
  0x72   : > { %4055 = dma.done.wait (%p4456_p13), [#allocation9], 4096   ;;  %p4457_p11 = pmov %p4454_p6 }
  0x73   : > { %v3502_v0 = vld [vmem:[#allocation5 + $0xac] ss:$12 sps:$4 sm:$0xff]   ;;  %v3506_v2 = vld [vmem:[#allocation5 + $0xa8] ss:$12 sps:$4 sm:$0xff]   ;;  %v3512_v6 = vld [vmem:[#allocation5 + $0x90] ss:$12 sps:$4 sm:$0xff]  }
  0x74   : > { %4057 = vsyncadd (%p4457_p11), [#allocation9], 4294963200  ;;  %v3504_v1 = vld [vmem:[#allocation5 + $0x22c] ss:$12 sps:$4 sm:$0xff]   ;;  %1376 = vmatprep.subr.bf16.mxu0 %v3502_v0  ;;  %v3507_v3 = vld [vmem:[#allocation5 + $0x228] ss:$12 sps:$4 sm:$0xff]  }
  0x75   : > { %1419 = vmatprep.subr.bf16.mxu1 %v3504_v1  ;;  %v3508_v4 = vld [vmem:[#allocation5 + $0x94] ss:$12 sps:$4 sm:$0xff]   ;;  %1377 = vmatpush1.bf16.msra.mxu0 %v3506_v2  ;;  %v3513_v7 = vld [vmem:[#allocation5 + $0x210] ss:$12 sps:$4 sm:$0xff]   ;;  %v3518_v10 = vld [vmem:[#allocation5 + $0x78] ss:$12 sps:$4 sm:$0xff]  }
  0x76   : > { %1420 = vmatpush1.bf16.msra.mxu1 %v3507_v3  ;;  %v3510_v5 = vld [vmem:[#allocation5 + $0x214] ss:$12 sps:$4 sm:$0xff]   ;;  %1378 = vmatprep.subr.bf16.mxu0 %v3508_v4  ;;  %v3514_v8 = vld [vmem:[#allocation5 + $0x7c] ss:$12 sps:$4 sm:$0xff]   ;;  %v3519_v11 = vld [vmem:[#allocation5 + $0x1f8] ss:$12 sps:$4 sm:$0xff]  }
  0x77   : > { %1421 = vmatprep.subr.bf16.mxu1 %v3510_v5  ;;  %v3516_v9 = vld [vmem:[#allocation5 + $0x1fc] ss:$12 sps:$4 sm:$0xff]   ;;  %v3520_v12 = vld [vmem:[#allocation5 + $0x64] ss:$12 sps:$4 sm:$0xff]   ;;  %v3524_v14 = vld [vmem:[#allocation5 + $0x60] ss:$12 sps:$4 sm:$0xff]  }
  0x78   : > { %v3522_v13 = vld [vmem:[#allocation5 + $0x1e4] ss:$12 sps:$4 sm:$0xff]   ;;  %v3525_v15 = vld [vmem:[#allocation5 + $0x1e0] ss:$12 sps:$4 sm:$0xff]   ;;  %v3530_v18 = vld [vmem:[#allocation5 + $0x48] ss:$12 sps:$4 sm:$0xff]  }
  0x79   : > { %1379 = vmatpush1.bf16.msra.mxu0 %v3512_v6  ;;  %v3526_v16 = vld [vmem:[#allocation5 + $0x4c] ss:$12 sps:$4 sm:$0xff]   ;;  %v3531_v19 = vld [vmem:[#allocation5 + $0x1c8] ss:$12 sps:$4 sm:$0xff]   ;;  %v3536_v22 = vld [vmem:[#allocation5 + $0x30] ss:$12 sps:$4 sm:$0xff]  }
  0x7a   : > { %1422 = vmatpush1.bf16.msra.mxu1 %v3513_v7  ;;  %1380 = vmatprep.subr.bf16.mxu0 %v3514_v8  ;;  %v3528_v17 = vld [vmem:[#allocation5 + $0x1cc] ss:$12 sps:$4 sm:$0xff]   ;;  %v3532_v20 = vld [vmem:[#allocation5 + $0x34] ss:$12 sps:$4 sm:$0xff]   ;;  %v3537_v23 = vld [vmem:[#allocation5 + $0x1b0] ss:$12 sps:$4 sm:$0xff]  }
  0x7b   : > { %1423 = vmatprep.subr.bf16.mxu1 %v3516_v9  ;;  %v3534_v21 = vld [vmem:[#allocation5 + $0x1b4] ss:$12 sps:$4 sm:$0xff]   ;;  %v3538_v24 = vld [vmem:[#allocation5 + $0x1c] ss:$12 sps:$4 sm:$0xff]   ;;  %v3542_v26 = vld [vmem:[#allocation5 + $0x18] ss:$12 sps:$4 sm:$0xff]  }
  0x7c   : > { %v3540_v25 = vld [vmem:[#allocation5 + $0x19c] ss:$12 sps:$4 sm:$0xff]   ;;  %v3543_v27 = vld [vmem:[#allocation5 + $0x198] ss:$12 sps:$4 sm:$0xff]   ;;  %v3548_v30 = vld [vmem:[#allocation5] ss:$12 sps:$4 sm:$0xff]  }
  0x7d   : > { %1381 = vmatpush1.bf16.msra.mxu0 %v3518_v10  ;;  %v3544_v28 = vld [vmem:[#allocation5 + $0x4] ss:$12 sps:$4 sm:$0xff]   ;;  %v3549_v31 = vld [vmem:[#allocation5 + $0x180] ss:$12 sps:$4 sm:$0xff]   ;;  %v3554_v34 = vld [vmem:[#allocation5 + $0x168] ss:$12 sps:$4 sm:$0xff]  }
  0x7e   : > { %1424 = vmatpush1.bf16.msra.mxu1 %v3519_v11  ;;  %1382 = vmatprep.subr.bf16.mxu0 %v3520_v12  ;;  %v3546_v29 = vld [vmem:[#allocation5 + $0x184] ss:$12 sps:$4 sm:$0xff]   ;;  %v3550_v32 = vld [vmem:[#allocation5 + $0x16c] ss:$12 sps:$4 sm:$0xff]   ;;  %v3555_v35 = vld [vmem:[#allocation5 + $0x2e8] ss:$12 sps:$4 sm:$0xff]  }
  0x7f   : > { %1425 = vmatprep.subr.bf16.mxu1 %v3522_v13  ;;  %v3552_v33 = vld [vmem:[#allocation5 + $0x2ec] ss:$12 sps:$4 sm:$0xff]   ;;  %v3556_v36 = vld [vmem:[#allocation5 + $0x154] ss:$12 sps:$4 sm:$0xff]   ;;  %v3560_v38 = vld [vmem:[#allocation5 + $0x150] ss:$12 sps:$4 sm:$0xff]  }
  0x80   : > { %v3558_v37 = vld [vmem:[#allocation5 + $0x2d4] ss:$12 sps:$4 sm:$0xff]   ;;  %v3561_v39 = vld [vmem:[#allocation5 + $0x2d0] ss:$12 sps:$4 sm:$0xff]   ;;  %v3566_v42 = vld [vmem:[#allocation5 + $0x138] ss:$12 sps:$4 sm:$0xff]  }
  0x81   : > { %1383 = vmatpush1.bf16.msra.mxu0 %v3524_v14  ;;  %v3562_v40 = vld [vmem:[#allocation5 + $0x13c] ss:$12 sps:$4 sm:$0xff]   ;;  %v3567_v43 = vld [vmem:[#allocation5 + $0x2b8] ss:$12 sps:$4 sm:$0xff]   ;;  %v3572_v46 = vld [vmem:[#allocation5 + $0x120] ss:$12 sps:$4 sm:$0xff]  }
  0x82   : > { %1426 = vmatpush1.bf16.msra.mxu1 %v3525_v15  ;;  %1384 = vmatprep.subr.bf16.mxu0 %v3526_v16  ;;  %v3564_v41 = vld [vmem:[#allocation5 + $0x2bc] ss:$12 sps:$4 sm:$0xff]   ;;  %v3568_v44 = vld [vmem:[#allocation5 + $0x124] ss:$12 sps:$4 sm:$0xff]   ;;  %v3573_v47 = vld [vmem:[#allocation5 + $0x2a0] ss:$12 sps:$4 sm:$0xff]  }
  0x83   : > { %1427 = vmatprep.subr.bf16.mxu1 %v3528_v17  ;;  %v3570_v45 = vld [vmem:[#allocation5 + $0x2a4] ss:$12 sps:$4 sm:$0xff]   ;;  %v3574_v48 = vld [vmem:[#allocation5 + $0x10c] ss:$12 sps:$4 sm:$0xff]   ;;  %v3578_v52 = vld [vmem:[#allocation5 + $0x108] ss:$12 sps:$4 sm:$0xff]  }
  0x84   : > { %v4304_v49 = vld [vmem:[%s4289_s30 + $0x4] ss:$28 sps:$4 sm:$0xff]   ;;  %v4307_v51 = vld [vmem:[%s4289_s30 + $0xc] ss:$28 sps:$4 sm:$0xff]   ;;  %v4089_v11 = vmov 0   ;;  %vm1372_vm0 = vcmask 130048  }
  0x85   : > { %1385 = vmatpush1.bf16.msra.mxu0 %v3530_v18  ;;  %v3576_v50 = vld [vmem:[#allocation5 + $0x28c] ss:$12 sps:$4 sm:$0xff]   ;;  %1408 = vmatprep.mubr.bf16.mxu0 %v4304_v49  ;;  %v3579_v53 = vld [vmem:[#allocation5 + $0x288] ss:$12 sps:$4 sm:$0xff]   ;;  %v3584_v56 = vld [vmem:[#allocation5 + $0xf0] ss:$12 sps:$4 sm:$0xff]  }
  0x86   : > { %1428 = vmatpush1.bf16.msra.mxu1 %v3531_v19  ;;  %1386 = vmatprep.subr.bf16.mxu0 %v3532_v20  ;;  %v3580_v54 = vld [vmem:[#allocation5 + $0xf4] ss:$12 sps:$4 sm:$0xff]   ;;  %v3585_v57 = vld [vmem:[#allocation5 + $0x270] ss:$12 sps:$4 sm:$0xff]   ;;  %v3590_v60 = vld [vmem:[#allocation5 + $0xd8] ss:$12 sps:$4 sm:$0xff]  }
  0x87   : > { %1429 = vmatprep.subr.bf16.mxu1 %v3534_v21  ;;  %1451 = vmatprep.mubr.bf16.mxu1 %v4307_v51  ;;  %v3582_v55 = vld [vmem:[#allocation5 + $0x274] ss:$12 sps:$4 sm:$0xff]   ;;  %v3586_v58 = vld [vmem:[#allocation5 + $0xdc] ss:$12 sps:$4 sm:$0xff]   ;;  %v3591_v61 = vld [vmem:[#allocation5 + $0x258] ss:$12 sps:$4 sm:$0xff]  }
  0x88   : > { %v3588_v59 = vld [vmem:[#allocation5 + $0x25c] ss:$12 sps:$4 sm:$0xff]   ;;  %v3592_v62 = vld [vmem:[#allocation5 + $0xc4] ss:$12 sps:$4 sm:$0xff]   ;;  %v3596_v0 = vld [vmem:[#allocation5 + $0xc0] ss:$12 sps:$4 sm:$0xff]  }
  0x89   : > { %1387 = vmatpush1.bf16.msra.mxu0 %v3536_v22  ;;  %v3594_v63 = vld [vmem:[#allocation5 + $0x244] ss:$12 sps:$4 sm:$0xff]   ;;  %v3597_v1 = vld [vmem:[#allocation5 + $0x240] ss:$12 sps:$4 sm:$0xff]   ;;  %v3604_v6 = vld [vmem:[#allocation5 + $0x3a8] ss:$12 sps:$4 sm:$0xff]  }
  0x8a   : > { %1430 = vmatpush1.bf16.msra.mxu1 %v3537_v23  ;;  %1388 = vmatprep.subr.bf16.mxu0 %v3538_v24  ;;  %v3606_v2 = vld [vmem:[#allocation5 + $0x3ac] ss:$12 sps:$4 sm:$0xff]   ;;  %v3609_v3 = vld [vmem:[#allocation5 + $0x484] ss:$12 sps:$4 sm:$0xff]   ;;  %v3612_v8 = vld [vmem:[#allocation5 + $0x394] ss:$12 sps:$4 sm:$0xff]  }
  0x8b   : > { %1431 = vmatprep.subr.bf16.mxu1 %v3540_v25  ;;  %v4312_v4 = vld [vmem:[%s4289_s30] ss:$28 sps:$4 sm:$0xff]   ;;  %v4315_v5 = vld [vmem:[%s4289_s30 + $0x8] ss:$28 sps:$4 sm:$0xff]   ;;  %v4321_v14 = vld [vmem:[%s4289_s30 + $0x18] ss:$28 sps:$4 sm:$0xff]  }
  0x8c   : > { %v3607_v7 = vld [vmem:[#allocation5 + $0x480] ss:$12 sps:$4 sm:$0xff]   ;;  %v3613_v9 = vld [vmem:[#allocation5 + $0x170] ss:$12 sps:$4 sm:$0xff]   ;;  %v3614_v13 = vld [vmem:[#allocation5 + $0x378] ss:$12 sps:$4 sm:$0xff]  }
  0x8d   : > { %1389 = vmatpush1.bf16.msra.mxu0 %v3542_v26  ;;  %v3610_v10 = vld [vmem:[#allocation5 + $0x390] ss:$12 sps:$4 sm:$0xff]   ;;  %v3619_v16 = vld [vmem:[#allocation5 + $0x158] ss:$12 sps:$4 sm:$0xff]   ;;  %v3620_v18 = vld [vmem:[#allocation5 + $0x360] ss:$12 sps:$4 sm:$0xff]  }
  0x8e   : > { %1432 = vmatpush1.bf16.msra.mxu1 %v3543_v27  ;;  %1390 = vmatprep.subr.bf16.mxu0 %v3544_v28  ;;  %v3616_v12 = vld [vmem:[#allocation5 + $0x37c] ss:$12 sps:$4 sm:$0xff]   ;;  %v3622_v17 = vld [vmem:[#allocation5 + $0x364] ss:$12 sps:$4 sm:$0xff]   ;;  %v3624_v20 = vld [vmem:[#allocation5 + $0x140] ss:$12 sps:$4 sm:$0xff]  }
  0x8f   : > { %1433 = vmatprep.subr.bf16.mxu1 %v3546_v29  ;;  %v3618_v15 = vld [vmem:[#allocation5 + $0xb0] ss:$12 sps:$4 sm:$0xff]   ;;  %v3623_v19 = vld [vmem:[#allocation5 + $0x98] ss:$12 sps:$4 sm:$0xff]   ;;  %v3625_v22 = vld [vmem:[#allocation5 + $0x348] ss:$12 sps:$4 sm:$0xff]  }
  0x90   : > { %v3627_v21 = vld [vmem:[#allocation5 + $0x34c] ss:$12 sps:$4 sm:$0xff]   ;;  %v3629_v24 = vld [vmem:[#allocation5 + $0x128] ss:$12 sps:$4 sm:$0xff]   ;;  %v3630_v26 = vld [vmem:[#allocation5 + $0x330] ss:$12 sps:$4 sm:$0xff]  }
  0x91   : > { %1391 = vmatpush1.bf16.msra.mxu0 %v3548_v30  ;;  %v3628_v23 = vld [vmem:[#allocation5 + $0x80] ss:$12 sps:$4 sm:$0xff]   ;;  %v3633_v27 = vld [vmem:[#allocation5 + $0x68] ss:$12 sps:$4 sm:$0xff]   ;;  %v3634_v28 = vld [vmem:[#allocation5 + $0x110] ss:$12 sps:$4 sm:$0xff]  }
  0x92   : > { %1434 = vmatpush1.bf16.msra.mxu1 %v3549_v31  ;;  %1392 = vmatprep.subr.bf16.mxu0 %v3550_v32  ;;  %v3632_v25 = vld [vmem:[#allocation5 + $0x334] ss:$12 sps:$4 sm:$0xff]   ;;  %v3637_v29 = vld [vmem:[#allocation5 + $0x31c] ss:$12 sps:$4 sm:$0xff]   ;;  %v3635_v30 = vld [vmem:[#allocation5 + $0x318] ss:$12 sps:$4 sm:$0xff]  }
  0x93   : > { %1435 = vmatprep.subr.bf16.mxu1 %v3552_v33  ;;  %v3638_v31 = vld [vmem:[#allocation5 + $0x50] ss:$12 sps:$4 sm:$0xff]   ;;  %v3639_v32 = vld [vmem:[#allocation5 + $0xf8] ss:$12 sps:$4 sm:$0xff]   ;;  %vm4091_vm1 = vmmov 0   ;;  %s2929_s18 = sshll.u32 %s4285_s17, 4 }
  0x94   : > { %v3642_v33 = vld [vmem:[#allocation5 + $0x304] ss:$12 sps:$4 sm:$0xff]   ;;  %s3195_s10 = sshll.u32 %s4151_s25, 8  ;;  %s328_s15 = scalar_lea.vmem [#allocation11], %s2929_s18 }
  0x95   : > { %1393 = vmatpush2.bf16.msra.mxu0 %v3554_v34  ;;  %v3640_v34 = vld [vmem:[#allocation5 + $0x300] ss:$12 sps:$4 sm:$0xff]   ;;  %s2803_s16 = sshll.u32 %s328_s15, 4  ;;  %s4389_s8 = scalar_lea.hbm %s4440_s6, %s3195_s10  ;;  %s4391_s16 = int_to_ptr.vmem [resolvable:$true] %s2803_s16 }
  0x96   : > { %1436 = vmatpush2.bf16.msra.mxu1 %v3555_v35  ;;  %1394 = vmatprep.subr.bf16.mxu0 %v3556_v36  ;;  %v3643_v35 = vld [vmem:[#allocation5 + $0x38] ss:$12 sps:$4 sm:$0xff]   ;;  %v3644_v36 = vld [vmem:[#allocation5 + $0xe0] ss:$12 sps:$4 sm:$0xff]   ;;  %s2790_s19 = scalar_lea.sflag [#allocation4], %s4285_s17  ;;  %s4004_s13 = scalar_lea.vmem %s4391_s16, 256 }
  0x97   : > { %1437 = vmatprep.subr.bf16.mxu1 %v3558_v37  ;;  %v3647_v37 = vld [vmem:[#allocation5 + $0x46c] ss:$12 sps:$4 sm:$0xff]   ;;  %p4005_p1 = scmp.ne.s32.totalorder %s4391_s16, %s4004_s13  ;;  %p4458_p2 = scmp.ne.s32.totalorder %s4450_s26, 0 }
  0x98   : > { %s4092_s25 = smov [#allocation11]  }
  0x99   : > { %1395 = vmatpush2.bf16.msra.mxu0 %v3560_v38  ;;  %v3645_v38 = vld [vmem:[#allocation5 + $0x468] ss:$12 sps:$4 sm:$0xff]   ;;  %p4006_p12 = pnand %p4005_p1, %p4458_p2  ;;  %s4008_s9 = sshll.u32 %s4092_s25, 4  ;;  %s4009_s9 = int_to_ptr.vmem [resolvable:$false] %s4008_s9 }
  0x9a   : > { %1438 = vmatpush2.bf16.msra.mxu1 %v3561_v39  ;;  %1396 = vmatprep.subr.bf16.mxu0 %v3562_v40  ;;  %v3648_v39 = vld [vmem:[#allocation5 + $0x20] ss:$12 sps:$4 sm:$0xff]   ;;  %v3649_v40 = vld [vmem:[#allocation5 + $0xc8] ss:$12 sps:$4 sm:$0xff]   ;;  %s4010_s11 = scalar_lea.vmem %s4009_s9, 512  ;;  %p4011_p9 = scmp.lt.s32.totalorder %s4391_s16, %s4009_s9 }
  0x9b   : > { %1439 = vmatprep.subr.bf16.mxu1 %v3564_v41  ;;  %v3652_v41 = vld [vmem:[#allocation5 + $0x454] ss:$12 sps:$4 sm:$0xff]   ;;  %p4007_p7 = pneg %p4006_p12  ;;  %p4012_p0 = scmp.lt.s32.totalorder %s4010_s11, %s4004_s13 }
  0x9d   : > { %1397 = vmatpush2.bf16.msra.mxu0 %v3566_v42  ;;  %v3650_v42 = vld [vmem:[#allocation5 + $0x450] ss:$12 sps:$4 sm:$0xff]   ;;  %p4013_p10 = por %p4012_p0, %p4011_p9 }
  0x9e   : > { %1440 = vmatpush2.bf16.msra.mxu1 %v3567_v43  ;;  %1398 = vmatprep.subr.bf16.mxu0 %v3568_v44  ;;  %v4327_v43 = vld [vmem:[%s4289_s30 + $0x14] ss:$28 sps:$4 sm:$0xff]   ;;  %v3653_v44 = vld [vmem:[#allocation5 + $0x8] ss:$12 sps:$4 sm:$0xff]  }
  0x9f   : > { %1441 = vmatprep.subr.bf16.mxu1 %v3570_v45  ;;  %v3654_v45 = vld [vmem:[#allocation5 + $0x2f0] ss:$12 sps:$4 sm:$0xff]   ;;  %p4014_p3 = pnand %p4013_p10, %p4007_p7 }
  0xa1   : > { %1399 = vmatpush2.bf16.msra.mxu0 %v3572_v46  ;;  %v3657_v46 = vld [vmem:[#allocation5 + $0x43c] ss:$12 sps:$4 sm:$0xff]  }
  0xa2   : > { %1442 = vmatpush2.bf16.msra.mxu1 %v3573_v47  ;;  %1400 = vmatprep.subr.bf16.mxu0 %v3574_v48  ;;  %v3655_v47 = vld [vmem:[#allocation5 + $0x438] ss:$12 sps:$4 sm:$0xff]   ;;  %v3658_v48 = vld [vmem:[#allocation5 + $0x230] ss:$12 sps:$4 sm:$0xff]  }
  0xa3   : > { %1443 = vmatprep.subr.bf16.mxu1 %v3576_v50  ;;  %v3662_v50 = vld [vmem:[#allocation5 + $0x424] ss:$12 sps:$4 sm:$0xff]  }
  0xa5   : > { %1401 = vmatpush2.bf16.msra.mxu0 %v3578_v52  ;;  %v3660_v52 = vld [vmem:[#allocation5 + $0x420] ss:$12 sps:$4 sm:$0xff]  }
  0xa6   : > { %1444 = vmatpush2.bf16.msra.mxu1 %v3579_v53  ;;  %1402 = vmatprep.subr.bf16.mxu0 %v3580_v54  ;;  %v3663_v53 = vld [vmem:[#allocation5 + $0x218] ss:$12 sps:$4 sm:$0xff]   ;;  %v3664_v54 = vld [vmem:[#allocation5 + $0x2c0] ss:$12 sps:$4 sm:$0xff]  }
  0xa7   : > { %1445 = vmatprep.subr.bf16.mxu1 %v3582_v55  ;;  %v3667_v55 = vld [vmem:[#allocation5 + $0x40c] ss:$12 sps:$4 sm:$0xff]  }
  0xa9   : > { %1403 = vmatpush2.bf16.msra.mxu0 %v3584_v56  ;;  %v3665_v56 = vld [vmem:[#allocation5 + $0x408] ss:$12 sps:$4 sm:$0xff]  }
  0xaa   : > { %1446 = vmatpush2.bf16.msra.mxu1 %v3585_v57  ;;  %1404 = vmatprep.subr.bf16.mxu0 %v3586_v58  ;;  %v3668_v57 = vld [vmem:[#allocation5 + $0x200] ss:$12 sps:$4 sm:$0xff]   ;;  %v3669_v58 = vld [vmem:[#allocation5 + $0x2a8] ss:$12 sps:$4 sm:$0xff]  }
  0xab   : > { %1447 = vmatprep.subr.bf16.mxu1 %v3588_v59  ;;  %v3672_v59 = vld [vmem:[#allocation5 + $0x3f4] ss:$12 sps:$4 sm:$0xff]  }
  0xad   : > { %1405 = vmatpush2.bf16.msra.mxu0 %v3590_v60  ;;  %v3670_v60 = vld [vmem:[#allocation5 + $0x3f0] ss:$12 sps:$4 sm:$0xff]  }
  0xae   : > { %1448 = vmatpush2.bf16.msra.mxu1 %v3591_v61  ;;  %1406 = vmatprep.subr.bf16.mxu0 %v3592_v62  ;;  %v3673_v61 = vld [vmem:[#allocation5 + $0x1e8] ss:$12 sps:$4 sm:$0xff]   ;;  %v3674_v62 = vld [vmem:[#allocation5 + $0x290] ss:$12 sps:$4 sm:$0xff]  }
  0xaf   : > { %1449 = vmatprep.subr.bf16.mxu1 %v3594_v63  ;;  %v3677_v63 = vld [vmem:[#allocation5 + $0x3dc] ss:$12 sps:$4 sm:$0xff]  }
  0xb1   : > { %1407 = vmatpush2.bf16.msra.mxu0 %v3596_v0  ;;  %v3675_v0 = vld [vmem:[#allocation5 + $0x3d8] ss:$12 sps:$4 sm:$0xff]  }
  0xb2   : > { %1450 = vmatpush2.bf16.msra.mxu1 %v3597_v1  ;;  %1462 = vmatprep.subr.bf16.mxu0 %v3606_v2  ;;  %v3678_v1 = vld [vmem:[#allocation5 + $0x1d0] ss:$12 sps:$4 sm:$0xff]   ;;  %v3679_v2 = vld [vmem:[#allocation5 + $0x278] ss:$12 sps:$4 sm:$0xff]  }
  0xb3   : > { %1519 = vmatprep.subr.bf16.mxu1 %v3609_v3  ;;  %v3680_v3 = vld [vmem:[#allocation5 + $0x3c0] ss:$12 sps:$4 sm:$0xff]  }
  0xb4   : > { %1409 = vmatmul.mubr.bf16.vlgmr.msra.gmra.mxu0 %v4312_v4 }
  0xb5   : > { %1452 = vmatmul.mubr.bf16.vlgmr.msra.gmra.mxu1 %v4315_v5  ;;  %1463 = vmatpush1.bf16.msra.mxu0 %v3604_v6  ;;  %v3687_v6 = vld [vmem:[#allocation5 + $0x260] ss:$12 sps:$4 sm:$0xff]  }
  0xb6   : > { %1520 = vmatpush1.bf16.msra.mxu1 %v3607_v7  ;;  %1464 = vmatprep.subr.bf16.mxu0 %v3612_v8  ;;  %v3689_v7 = vld [vmem:[#allocation5 + $0x470] ss:$12 sps:$4 sm:$0xff]  }
  0xb7   : > { %1537 = vmatprep.mubr.bf16.mxu1 %v4089_v11  ;;  %3196 = vmatprep.subr.bf16.mxu1 %v3613_v9  ;;  %v4333_v8 = vld [vmem:[%s4289_s30 + $0x10] ss:$28 sps:$4 sm:$0xff]  }
  0xb8   : > { %1494 = vmatprep.mubr.bf16.mxu0 %v4327_v43  ;;  %v3688_v9 = vld [vmem:[#allocation5 + $0x1a0] ss:$12 sps:$4 sm:$0xff]  }
  0xb9   : > { %1465 = vmatpush1.bf16.msra.mxu0 %v3610_v10  ;;  %v3690_v10 = vld [vmem:[#allocation5 + $0x3b0] ss:$12 sps:$4 sm:$0xff]  }
  0xba   : > { %1466 = vmatprep.subr.bf16.mxu0 %v3616_v12  ;;  %v3691_v12 = vld [vmem:[#allocation5 + $0x248] ss:$12 sps:$4 sm:$0xff]  }
  0xbd   : > { %3084 = vmatmul.mubr.msk.bf16.vlgmr.msra.gmra.mxu1 %vm1372_vm0, %v4321_v14  ;;  %1467 = vmatpush1.bf16.msra.mxu0 %v3614_v13  ;;  %v3693_v13 = vld [vmem:[#allocation5 + $0x458] ss:$12 sps:$4 sm:$0xff]  }
  0xbe   : > { %3197 = vmatpush3.bf16.msra.mxu1 %v3618_v15  ;;  %1468 = vmatprep.subr.bf16.mxu0 %v3622_v17  ;;  %v3692_v15 = vld [vmem:[#allocation5 + $0x188] ss:$12 sps:$4 sm:$0xff]   ;;  %v3695_v17 = vld [vmem:[#allocation5 + $0x440] ss:$12 sps:$4 sm:$0xff]  }
  0xbf   : > { %3198 = vmatprep.subr.bf16.mxu1 %v3619_v16  ;;  %1580 = vmatprep.mubr.bf16.mxu1 %v4304_v49  ;;  %v3659_v49 = vld [vmem:[#allocation5 + $0x2d8] ss:$12 sps:$4 sm:$0xff]  }
  0xc0   : > { %v3694_v16 = vld [vmem:[#allocation5 + $0x398] ss:$12 sps:$4 sm:$0xff]  }
  0xc1   : > { %1469 = vmatpush1.bf16.msra.mxu0 %v3620_v18  ;;  %v3696_v18 = vld [vmem:[#allocation5 + $0x380] ss:$12 sps:$4 sm:$0xff]  }
  0xc2   : > { %3199 = vmatpush3.bf16.msra.mxu1 %v3623_v19  ;;  %1470 = vmatprep.subr.bf16.mxu0 %v3627_v21  ;;  %v3707_v19 = vld [vmem:[#allocation5 + $0x488] ss:$12 sps:$4 sm:$0xff]   ;;  %v4090_v21 = vmov 0.0  }
  0xc3   : > { %3200 = vmatprep.subr.bf16.mxu1 %v3624_v20  ;;  %v3697_v20 = vld [vmem:[#allocation5 + $0x428] ss:$12 sps:$4 sm:$0xff]  }
  0xc5   : > { %1471 = vmatpush1.bf16.msra.mxu0 %v3625_v22  ;;  %v3698_v22 = vld [vmem:[#allocation5 + $0x368] ss:$12 sps:$4 sm:$0xff]  }
  0xc6   : > { %3201 = vmatpush3.bf16.msra.mxu1 %v3628_v23  ;;  %1472 = vmatprep.subr.bf16.mxu0 %v3632_v25  ;;  %v3699_v23 = vld [vmem:[#allocation5 + $0x410] ss:$12 sps:$4 sm:$0xff]   ;;  %v3708_v25 = vld [vmem:[#allocation7 + $0xa8] ss:$12 sps:$4 sm:$0xff]  }
  0xc7   : > { %3202 = vmatprep.subr.bf16.mxu1 %v3629_v24  ;;  %v3700_v24 = vld [vmem:[#allocation5 + $0x350] ss:$12 sps:$4 sm:$0xff]  }
  0xc9   : > { %1473 = vmatpush1.bf16.msra.mxu0 %v3630_v26  ;;  %v3710_v26 = vld [vmem:[#allocation7 + $0xac] ss:$12 sps:$4 sm:$0xff]  }
  0xca   : > { %3203 = vmatpush3.bf16.msra.mxu1 %v3633_v27  ;;  %1474 = vmatprep.subr.bf16.mxu0 %v3637_v29  ;;  %v3701_v27 = vld [vmem:[#allocation5 + $0x3f8] ss:$12 sps:$4 sm:$0xff]  }
  0xcb   : > { %3204 = vmatprep.subr.bf16.mxu1 %v3634_v28  ;;  %v3713_v28 = vld [vmem:[#allocation7 + $0x94] ss:$12 sps:$4 sm:$0xff]  }
  0xcc   : > { %v3702_v29 = vld [vmem:[#allocation5 + $0x338] ss:$12 sps:$4 sm:$0xff]  }
  0xcd   : > { %1475 = vmatpush1.bf16.msra.mxu0 %v3635_v30  ;;  %v3711_v30 = vld [vmem:[#allocation7 + $0x90] ss:$12 sps:$4 sm:$0xff]  }
  0xce   : > { %3205 = vmatpush3.bf16.msra.mxu1 %v3638_v31  ;;  %1476 = vmatprep.subr.bf16.mxu0 %v3642_v33  ;;  %v3716_v31 = vld [vmem:[#allocation7 + $0x7c] ss:$12 sps:$4 sm:$0xff]   ;;  %v3714_v33 = vld [vmem:[#allocation7 + $0x78] ss:$12 sps:$4 sm:$0xff]  }
  0xcf   : > { %3206 = vmatprep.subr.bf16.mxu1 %v3639_v32  ;;  %v3704_v32 = vld [vmem:[#allocation5 + $0x320] ss:$12 sps:$4 sm:$0xff]  }
  0xd1   : > { %1477 = vmatpush1.bf16.msra.mxu0 %v3640_v34  ;;  %v3705_v34 = vld [vmem:[#allocation5 + $0x3c8] ss:$12 sps:$4 sm:$0xff]  }
  0xd2   : > { %3207 = vmatpush3.bf16.msra.mxu1 %v3643_v35  ;;  %1478 = vmatprep.subr.bf16.mxu0 %v3647_v37  ;;  %v3719_v35 = vld [vmem:[#allocation7 + $0x64] ss:$12 sps:$4 sm:$0xff]   ;;  %v3717_v37 = vld [vmem:[#allocation7 + $0x60] ss:$12 sps:$4 sm:$0xff]  }
  0xd3   : > { %3208 = vmatprep.subr.bf16.mxu1 %v3644_v36  ;;  %v3706_v36 = vld [vmem:[#allocation5 + $0x308] ss:$12 sps:$4 sm:$0xff]  }
  0xd5   : > { %1479 = vmatpush2.bf16.msra.mxu0 %v3645_v38  ;;  %v3722_v38 = vld [vmem:[#allocation7 + $0x4c] ss:$12 sps:$4 sm:$0xff]  }
  0xd6   : > { %3209 = vmatpush3.bf16.msra.mxu1 %v3648_v39  ;;  %1480 = vmatprep.subr.bf16.mxu0 %v3652_v41  ;;  %v3725_v39 = vld [vmem:[#allocation7 + $0x34] ss:$12 sps:$4 sm:$0xff]   ;;  %v3728_v41 = vld [vmem:[#allocation7 + $0x1c] ss:$12 sps:$4 sm:$0xff]  }
  0xd7   : > { %3210 = vmatprep.subr.bf16.mxu1 %v3649_v40  ;;  %v3723_v40 = vld [vmem:[#allocation7 + $0x30] ss:$12 sps:$4 sm:$0xff]  }
  0xd9   : > { %1481 = vmatpush2.bf16.msra.mxu0 %v3650_v42  ;;  %v3726_v42 = vld [vmem:[#allocation7 + $0x18] ss:$12 sps:$4 sm:$0xff]  }
  0xda   : > { %3211 = vmatpush3.bf16.msra.mxu1 %v3653_v44  ;;  %1482 = vmatprep.subr.bf16.mxu0 %v3657_v46  ;;  %v3731_v44 = vld [vmem:[#allocation7 + $0x4] ss:$12 sps:$4 sm:$0xff]   ;;  %v3734_v46 = vld [vmem:[#allocation7 + $0x16c] ss:$12 sps:$4 sm:$0xff]  }
  0xdb   : > { %3218 = vmatprep.subr.bf16.mxu1 %v3654_v45  ;;  %v3732_v45 = vld [vmem:[#allocation7 + $0x168] ss:$12 sps:$4 sm:$0xff]  }
  0xdd   : > { %1581 = vmatmul.mubr.bf16.vlgmr.msra.gmra.mxu1 %v4312_v4  ;;  %1483 = vmatpush2.bf16.msra.mxu0 %v3655_v47  ;;  %v3683_v4 = vld [vmem:[#allocation5 + $0x1b8] ss:$12 sps:$4 sm:$0xff]  }
  0xde   : > { %3219 = vmatpush3.bf16.msra.mxu1 %v3658_v48  ;;  %1484 = vmatprep.subr.bf16.mxu0 %v3662_v50  ;;  %v3737_v47 = vld [vmem:[#allocation7 + $0x154] ss:$12 sps:$4 sm:$0xff]   ;;  %v3735_v48 = vld [vmem:[#allocation7 + $0x150] ss:$12 sps:$4 sm:$0xff]   ;;  %v3738_v50 = vld [vmem:[#allocation7 + $0x138] ss:$12 sps:$4 sm:$0xff]  }
  0xdf   : > { %3220 = vmatprep.subr.bf16.mxu1 %v3659_v49  ;;  %1621 = vmatprep.mubr.bf16.mxu1 %v4307_v51  ;;  %v3682_v51 = vld [vmem:[#allocation5 + $0x3c4] ss:$12 sps:$4 sm:$0xff]   ;;  %v3740_v49 = vld [vmem:[#allocation7 + $0x13c] ss:$12 sps:$4 sm:$0xff]  }
  0xe1   : > { %1485 = vmatpush2.bf16.msra.mxu0 %v3660_v52  ;;  %v3741_v52 = vld [vmem:[#allocation7 + $0x120] ss:$12 sps:$4 sm:$0xff]  }
  0xe2   : > { %3221 = vmatpush3.bf16.msra.mxu1 %v3663_v53  ;;  %1486 = vmatprep.subr.bf16.mxu0 %v3667_v55  ;;  %v3746_v53 = vld [vmem:[#allocation7 + $0x10c] ss:$12 sps:$4 sm:$0xff]   ;;  %v3749_v55 = vld [vmem:[#allocation7 + $0xf4] ss:$12 sps:$4 sm:$0xff]  }
  0xe3   : > { %3222 = vmatprep.subr.bf16.mxu1 %v3664_v54  ;;  %v3744_v54 = vld [vmem:[#allocation7 + $0x108] ss:$12 sps:$4 sm:$0xff]  }
  0xe5   : > { %1487 = vmatpush2.bf16.msra.mxu0 %v3665_v56  ;;  %v3747_v56 = vld [vmem:[#allocation7 + $0xf0] ss:$12 sps:$4 sm:$0xff]  }
  0xe6   : > { %3223 = vmatpush3.bf16.msra.mxu1 %v3668_v57  ;;  %1488 = vmatprep.subr.bf16.mxu0 %v3672_v59  ;;  %v3752_v57 = vld [vmem:[#allocation7 + $0xdc] ss:$12 sps:$4 sm:$0xff]   ;;  %v3755_v59 = vld [vmem:[#allocation7 + $0xc4] ss:$12 sps:$4 sm:$0xff]  }
  0xe7   : > { %3224 = vmatprep.subr.bf16.mxu1 %v3669_v58  ;;  %v3750_v58 = vld [vmem:[#allocation7 + $0xd8] ss:$12 sps:$4 sm:$0xff]  }
  0xe9   : > { %1489 = vmatpush2.bf16.msra.mxu0 %v3670_v60  ;;  %v3753_v60 = vld [vmem:[#allocation7 + $0xc0] ss:$12 sps:$4 sm:$0xff]  }
  0xea   : > { %3225 = vmatpush3.bf16.msra.mxu1 %v3673_v61  ;;  %1490 = vmatprep.subr.bf16.mxu0 %v3677_v63  ;;  %v3758_v61 = vld [vmem:[#allocation7 + $0x22c] ss:$12 sps:$4 sm:$0xff]   ;;  %v3762_v63 = vld [vmem:[#allocation7 + $0x214] ss:$12 sps:$4 sm:$0xff]  }
  0xeb   : > { %3226 = vmatprep.subr.bf16.mxu1 %v3674_v62  ;;  %v3756_v62 = vld [vmem:[#allocation7 + $0x228] ss:$12 sps:$4 sm:$0xff]  }
  0xed   : > { %1491 = vmatpush2.bf16.msra.mxu0 %v3675_v0  ;;  %v3760_v0 = vld [vmem:[#allocation7 + $0x210] ss:$12 sps:$4 sm:$0xff]  }
  0xee   : > { %3227 = vmatpush3.bf16.msra.mxu1 %v3678_v1  ;;  %1492 = vmatprep.subr.bf16.mxu0 %v3682_v51  ;;  %v3766_v1 = vld [vmem:[#allocation7 + $0x1fc] ss:$12 sps:$4 sm:$0xff]   ;;  %v3770_v51 = vld [vmem:[#allocation7 + $0x1e4] ss:$12 sps:$4 sm:$0xff]  }
  0xef   : > { %3228 = vmatprep.subr.bf16.mxu1 %v3679_v2  ;;  %v3764_v2 = vld [vmem:[#allocation7 + $0x1f8] ss:$12 sps:$4 sm:$0xff]  }
  0xf1   : > { %1493 = vmatpush2.bf16.msra.mxu0 %v3680_v3  ;;  %v3768_v3 = vld [vmem:[#allocation7 + $0x1e0] ss:$12 sps:$4 sm:$0xff]  }
  0xf2   : > { %3229 = vmatpush3.bf16.msra.mxu1 %v3683_v4  ;;  %3240 = vmatprep.subr.bf16.mxu0 %v3689_v7  ;;  %v3774_v4 = vld [vmem:[#allocation7 + $0x1cc] ss:$12 sps:$4 sm:$0xff]   ;;  %v3778_v7 = vld [vmem:[#allocation7 + $0x1b4] ss:$12 sps:$4 sm:$0xff]  }
  0xf3   : > { %3230 = vmatprep.subr.bf16.mxu1 %v3687_v6  ;;  %v3772_v6 = vld [vmem:[#allocation7 + $0x1c8] ss:$12 sps:$4 sm:$0xff]  }
  0xf4   : > { %1495 = vmatmul.mubr.bf16.vlgmr.msra.gmra.mxu0 %v4333_v8 }
  0xf5   : > { %3241 = vmatpush3.bf16.msra.mxu0 %v3690_v10  ;;  %1662 = vmatprep.mubr.bf16.mxu0 %v4327_v43  ;;  %v3729_v43 = vld [vmem:[#allocation7] ss:$12 sps:$4 sm:$0xff]   ;;  %v3780_v10 = vld [vmem:[#allocation7 + $0x198] ss:$12 sps:$4 sm:$0xff]  }
  0xf6   : > { %3231 = vmatpush3.bf16.msra.mxu1 %v3688_v9  ;;  %3242 = vmatprep.subr.bf16.mxu0 %v3693_v13  ;;  %v3782_v9 = vld [vmem:[#allocation7 + $0x19c] ss:$12 sps:$4 sm:$0xff]   ;;  %v3784_v13 = vld [vmem:[#allocation7 + $0x180] ss:$12 sps:$4 sm:$0xff]  }
  0xf7   : > { %3232 = vmatprep.subr.bf16.mxu1 %v3691_v12  ;;  %v3786_v12 = vld [vmem:[#allocation7 + $0x184] ss:$12 sps:$4 sm:$0xff]  }
  0xf9   : > { %3243 = vmatpush3.bf16.msra.mxu0 %v3694_v16 }
  0xfa   : > { %3233 = vmatpush3.bf16.msra.mxu1 %v3692_v15  ;;  %3244 = vmatprep.subr.bf16.mxu0 %v3695_v17  ;;  %v3788_v15 = vld [vmem:[#allocation7 + $0x170] ss:$12 sps:$4 sm:$0xff]  }
  0xfb   : > { %3335 = vmatprep.subr.bf16.mxu1 %v4090_v21 }
  0xfd   : > { %1622 = vmatmul.mubr.bf16.vlgmr.msra.gmra.mxu1 %v4315_v5  ;;  %3245 = vmatpush3.bf16.msra.mxu0 %v3696_v18  ;;  %v3703_v5 = vld [vmem:[#allocation5 + $0x3e0] ss:$12 sps:$4 sm:$0xff]  }
  0xfe   : > { %3336 = vmatpush3.bf16.msra.mxu1 %v3707_v19  ;;  %3246 = vmatprep.subr.bf16.mxu0 %v3697_v20 }
  0xff   : > { %3337 = vmatprep.mubr.msk.bf16.mxu1 %vm4091_vm1, %v4090_v21  ;;  %2201 = vmatprep.subr.bf16.mxu1 %v3710_v26 }
 0x101   : > { %3247 = vmatpush3.bf16.msra.mxu0 %v3698_v22  ;;  %v538_v22 = vlaneseq }
 0x102   : > { %3248 = vmatprep.subr.bf16.mxu0 %v3699_v23 }
 0x105   : > { %3338 = vmatmul.mubr.msk.bf16.vlgmr.msra.gmra.mxu1 %vm1372_vm0, %v4321_v14  ;;  %3249 = vmatpush3.bf16.msra.mxu0 %v3700_v24  ;;  %v3720_v14 = vld [vmem:[#allocation7 + $0x48] ss:$12 sps:$4 sm:$0xff]   ;;  %v539_v24 = vshrl.u32 %v538_v22, 7 }
 0x106   : > { %2202 = vmatpush1.bf16.msra.mxu1 %v3708_v25  ;;  %3250 = vmatprep.subr.bf16.mxu0 %v3701_v27 }
 0x107   : > { %2203 = vmatprep.subr.bf16.mxu1 %v3713_v28  ;;  %v544_v27 = vsub.s32 1, %v539_v24  ;;  %v536_v28 = vld [vmem:[%s4436_s2] sm:$0x7] }
 0x109   : > { %3251 = vmatpush3.bf16.msra.mxu0 %v3702_v29  ;;  %v540_v29 = vsub.s32 0, %v539_v24 }
 0x10a   : > { %2204 = vmatpush1.bf16.msra.mxu1 %v3711_v30  ;;  %3252 = vmatprep.subr.bf16.mxu0 %v3703_v5 }
 0x10b   : > { %2205 = vmatprep.subr.bf16.mxu1 %v3716_v31  ;;  %v545_v31 = vrot.slane %v536_v28, %v544_v27 }
 0x10d   : > { %3253 = vmatpush3.bf16.msra.mxu0 %v3704_v32  ;;  %v541_v32 = vrot.slane %v536_v28, %v540_v29  ;;  %v3771_v29 = vld [vmem:[#allocation7 + $0x1e8] ss:$12 sps:$4 sm:$0xff]  }
 0x10e   : > { %2206 = vmatpush1.bf16.msra.mxu1 %v3714_v33  ;;  %3254 = vmatprep.subr.bf16.mxu0 %v3705_v34 }
 0x10f   : > { %2207 = vmatprep.subr.bf16.mxu1 %v3719_v35 }
 0x111   : > { %3255 = vmatpush3.bf16.msra.mxu0 %v3706_v36 }
 0x112   : > { %2208 = vmatpush1.bf16.msra.mxu1 %v3717_v37  ;;  %2244 = vmatprep.subr.bf16.mxu0 %v3758_v61 }
 0x113   : > { %2209 = vmatprep.subr.bf16.mxu1 %v3722_v38 }
 0x114   : > { %1663 = vmatmul.mubr.bf16.vlgmr.msra.gmra.mxu0 %v4333_v8  ;;  %v3776_v8 = vld [vmem:[#allocation7 + $0x1b0] ss:$12 sps:$4 sm:$0xff]  }
 0x115   : > { %2276 = vmatprep.mubr.bf16.mxu0 %v4089_v11  ;;  %v3743_v11 = vld [vmem:[#allocation7 + $0x124] ss:$12 sps:$4 sm:$0xff]   ;;  %2245 = vmatpush1.bf16.msra.mxu0 %v3756_v62 }
 0x116   : > { %2210 = vmatpush1.bf16.msra.mxu1 %v3720_v14  ;;  %2246 = vmatprep.subr.bf16.mxu0 %v3762_v63 }
 0x117   : > { %2211 = vmatprep.subr.bf16.mxu1 %v3725_v39 }
 0x119   : > { %2247 = vmatpush1.bf16.msra.mxu0 %v3760_v0 }
 0x11a   : > { %2212 = vmatpush1.bf16.msra.mxu1 %v3723_v40  ;;  %2248 = vmatprep.subr.bf16.mxu0 %v3766_v1 }
 0x11b   : > { %2213 = vmatprep.subr.bf16.mxu1 %v3728_v41 }
 0x11d   : > { %2249 = vmatpush1.bf16.msra.mxu0 %v3764_v2 }
 0x11e   : > { %2214 = vmatpush1.bf16.msra.mxu1 %v3726_v42  ;;  %2250 = vmatprep.subr.bf16.mxu0 %v3770_v51 }
 0x11f   : > { %2215 = vmatprep.subr.bf16.mxu1 %v3731_v44 }
 0x121   : > { %2251 = vmatpush1.bf16.msra.mxu0 %v3768_v3 }
 0x122   : > { %2216 = vmatpush1.bf16.msra.mxu1 %v3729_v43  ;;  %2252 = vmatprep.subr.bf16.mxu0 %v3774_v4 }
 0x123   : > { %2217 = vmatprep.subr.bf16.mxu1 %v3734_v46 }
 0x125   : > { %2253 = vmatpush1.bf16.msra.mxu0 %v3772_v6  ;;  %v548_v6 = vsub.s32 2, %v539_v24 }
 0x126   : > { %2218 = vmatpush2.bf16.msra.mxu1 %v3732_v45  ;;  %2254 = vmatprep.subr.bf16.mxu0 %v3778_v7 }
 0x127   : > { %2219 = vmatprep.subr.bf16.mxu1 %v3737_v47 }
 0x129   : > { %2255 = vmatpush1.bf16.msra.mxu0 %v3776_v8  ;;  %v3759_v8 = vld [vmem:[#allocation7 + $0x230] ss:$12 sps:$4 sm:$0xff]  }
 0x12a   : > { %2220 = vmatpush2.bf16.msra.mxu1 %v3735_v48  ;;  %2256 = vmatprep.subr.bf16.mxu0 %v3782_v9 }
 0x12b   : > { %2221 = vmatprep.subr.bf16.mxu1 %v3740_v49 }
 0x12d   : > { %2257 = vmatpush1.bf16.msra.mxu0 %v3780_v10  ;;  %v549_v10 = vrot.slane %v536_v28, %v548_v6  ;;  %v3818_v6 = vld [vmem:[#allocation8 + $0x40] sm:$0xff]  }
 0x12e   : > { %2222 = vmatpush2.bf16.msra.mxu1 %v3738_v50  ;;  %2258 = vmatprep.subr.bf16.mxu0 %v3786_v12 }
 0x12f   : > { %2223 = vmatprep.subr.bf16.mxu1 %v3743_v11 }
 0x131   : > { %2259 = vmatpush1.bf16.msra.mxu0 %v3784_v13  ;;  %v3763_v13 = vld [vmem:[#allocation7 + $0x218] ss:$12 sps:$4 sm:$0xff]  }
 0x132   : > { %2224 = vmatpush2.bf16.msra.mxu1 %v3741_v52  ;;  %3264 = vmatprep.subr.bf16.mxu0 %v3788_v15 }
 0x133   : > { %2225 = vmatprep.subr.bf16.mxu1 %v3746_v53 }
 0x136   : > { %2226 = vmatpush2.bf16.msra.mxu1 %v3744_v54 }
 0x137   : > { %2227 = vmatprep.subr.bf16.mxu1 %v3749_v55 }
 0x13a   : > { %2228 = vmatpush2.bf16.msra.mxu1 %v3747_v56 }
 0x13b   : > { %2229 = vmatprep.subr.bf16.mxu1 %v3752_v57 }
 0x13e   : > { %2230 = vmatpush2.bf16.msra.mxu1 %v3750_v58 }
 0x13f   : > { %2231 = vmatprep.subr.bf16.mxu1 %v3755_v59 }
 0x142   : > { %2232 = vmatpush2.bf16.msra.mxu1 %v3753_v60 }
 0x143   : > { %3341 = vmatprep.subr.bf16.mxu1 %v4090_v21 }
 0x174   : > { %v1410_v25 = vpop.f32.mrf.mxu0 }
 0x175   : > { %v1453_v16 = vpop.f32.mrf.mxu1  ;;  %v1411_v36 = vadd.f32 %v1410_v25, %v541_v32 }
 0x176   : > { %v1412_v5 = vpop.f32.mrf.mxu0 }
 0x177   : > { %v1455_v17 = vpop.f32.mrf.mxu1  ;;  %v1413_v35 = vadd.f32 %v1412_v5, %v545_v31  ;;  %v1454_v42 = vadd.f32 %v1453_v16, %v1411_v36  ;;  %v3779_v36 = vld [vmem:[#allocation7 + $0x1b8] ss:$12 sps:$4 sm:$0xff]  }
 0x178   : > { %v1414_v33 = vpop.f32.mrf.mxu0 }
 0x179   : > { %v1457_v18 = vpop.f32.mrf.mxu1  ;;  %v1415_v14 = vadd.f32 %v1414_v33, %v541_v32  ;;  %v1456_v40 = vadd.f32 %v1455_v17, %v1413_v35 }
 0x17a   : > { %v1416_v37 = vpop.f32.mrf.mxu0 }
 0x17b   : > { %v1459_v19 = vpop.f32.mrf.mxu1  ;;  %v1417_v41 = vadd.f32 %v1416_v37, %v545_v31  ;;  %v1458_v45 = vadd.f32 %v1457_v18, %v1415_v14  ;;  %v3783_v37 = vld [vmem:[#allocation7 + $0x1a0] ss:$12 sps:$4 sm:$0xff]  }
 0x17d   : > { %v1539_v20 = vpop.f32.mrf.mxu1  ;;  %v1460_v49 = vadd.f32 %v1459_v19, %v1417_v41  ;;  %v3767_v19 = vld [vmem:[#allocation7 + $0x200] ss:$12 sps:$4 sm:$0xff]  }
 0x17f   : > { %v1541_v23 = vpop.f32.mrf.mxu1 }
 0x181   : > { %v1543_v26 = vpop.f32.mrf.mxu1 }
 0x183   : > { %v1545_v30 = vpop.f32.mrf.mxu1 }
 0x19d   : > { %v3212_v34 = vpop.f32.mrf.mxu1 }
 0x19f   : > { %v3213_v38 = vpop.f32.mrf.mxu1 }
 0x1a0   : > { %v3214_v12 = vadd.f32 %v3213_v38, %v3212_v34  ;;  %v3775_v34 = vld [vmem:[#allocation7 + $0x1d0] ss:$12 sps:$4 sm:$0xff]   ;;  %v3787_v38 = vld [vmem:[#allocation7 + $0x188] ss:$12 sps:$4 sm:$0xff]  }
 0x1a1   : > { %v3215_v43 = vpop.f32.mrf.mxu1 }
 0x1a2   : > { %v1583_v17 = vadd.f32 %v3214_v12, %v549_v10  ;;  %v3823_v12 = vld [vmem:[#allocation8 + $0xa0] sm:$0xff]  }
 0x1a3   : > { %v3216_v52 = vpop.f32.mrf.mxu1 }
 0x1a4   : > { %v3217_v18 = vadd.f32 %v3216_v52, %v3215_v43  ;;  %v3791_v43 = vld [vmem:[#allocation7 + $0x98] ss:$12 sps:$4 sm:$0xff]   ;;  %v3800_v52 = vld [vmem:[#allocation7 + $0xe0] ss:$12 sps:$4 sm:$0xff]  }
 0x1a6   : > { %v1586_v27 = vadd.f32 %v3217_v18, %v549_v10  ;;  %v3822_v10 = vld [vmem:[#allocation8 + $0xa8] sm:$0xff]  }
 0x1b4   : > { %v1496_v39 = vpop.f32.mrf.mxu0 }
 0x1b5   : > { %v1497_v47 = vadd.f32 %v1496_v39, %v1454_v42  ;;  %v3790_v42 = vld [vmem:[#allocation7 + $0x158] ss:$12 sps:$4 sm:$0xff]  }
 0x1b6   : > { %v1498_v44 = vpop.f32.mrf.mxu0 }
 0x1b7   : > { %v1499_v46 = vadd.f32 %v1498_v44, %v1456_v40  ;;  %v1540_v56 = vadd.f32 %v1539_v20, %v1497_v47  ;;  %v3789_v40 = vld [vmem:[#allocation7 + $0xb0] ss:$12 sps:$4 sm:$0xff]   ;;  %v3792_v44 = vld [vmem:[#allocation7 + $0x140] ss:$12 sps:$4 sm:$0xff]   ;;  %v3795_v47 = vld [vmem:[#allocation7 + $0x68] ss:$12 sps:$4 sm:$0xff]  }
 0x1b8   : > { %v1500_v48 = vpop.f32.mrf.mxu0 }
 0x1b9   : > { %v1542_v50 = vadd.f32 %v1541_v23, %v1499_v46  ;;  %v1501_v11 = vadd.f32 %v1500_v48, %v1458_v45  ;;  %v3793_v45 = vld [vmem:[#allocation7 + $0x80] ss:$12 sps:$4 sm:$0xff]   ;;  %v3794_v46 = vld [vmem:[#allocation7 + $0x128] ss:$12 sps:$4 sm:$0xff]   ;;  %v3796_v48 = vld [vmem:[#allocation7 + $0x110] ss:$12 sps:$4 sm:$0xff]  }
 0x1ba   : > { %v1502_v53 = vpop.f32.mrf.mxu0 }
 0x1bb   : > { %v1544_v54 = vadd.f32 %v1543_v26, %v1501_v11  ;;  %v1503_v55 = vadd.f32 %v1502_v53, %v1460_v49  ;;  %3836 = vtanh.f32 %v1542_v50  ;;  %v3797_v49 = vld [vmem:[#allocation7 + $0x50] ss:$12 sps:$4 sm:$0xff]   ;;  %v3798_v50 = vld [vmem:[#allocation7 + $0xf8] ss:$12 sps:$4 sm:$0xff]   ;;  %v3801_v53 = vld [vmem:[#allocation7 + $0x20] ss:$12 sps:$4 sm:$0xff]  }
 0x1bc   : > { %v3799_v11 = vld [vmem:[#allocation7 + $0x38] ss:$12 sps:$4 sm:$0xff]  }
 0x1bd   : > { %v3234_v57 = vpop.f32.mrf.mxu1  ;;  %v1546_v58 = vadd.f32 %v1545_v30, %v1503_v55  ;;  %3838 = vtanh.f32 %v1544_v54  ;;  %v3802_v54 = vld [vmem:[#allocation7 + $0xc8] ss:$12 sps:$4 sm:$0xff]  }
 0x1be   : > { %v3803_v55 = vld [vmem:[#allocation7 + $0x8] ss:$12 sps:$4 sm:$0xff]  }
 0x1bf   : > { %v3235_v59 = vpop.f32.mrf.mxu1  ;;  %3840 = vtanh.f32 %v1546_v58  ;;  %v3806_v58 = vld [vmem:[#allocation8 + $0x70] sm:$0xff]  }
 0x1c0   : > { %3842 = vtanh.f32 %v1540_v56  ;;  %v3236_v15 = vadd.f32 %v3235_v59, %v3234_v57  ;;  %v3804_v56 = vld [vmem:[#allocation8 + $0x78] sm:$0xff]   ;;  %v3807_v59 = vld [vmem:[#allocation8 + $0x30] sm:$0xff]  }
 0x1c1   : > { %v3237_v60 = vpop.f32.mrf.mxu1  ;;  %v3805_v57 = vld [vmem:[#allocation8 + $0x38] sm:$0xff]  }
 0x1c2   : > { %v1624_v23 = vadd.f32 %v3236_v15, %v1583_v17  ;;  %v3825_v15 = vld [vmem:[#allocation8 + $0x90] sm:$0xff]   ;;  %v3827_v17 = vld [vmem:[#allocation8 + $0x80] sm:$0xff]  }
 0x1c3   : > { %v3238_v61 = vpop.f32.mrf.mxu1 }
 0x1c4   : > { %v3239_v24 = vadd.f32 %v3238_v61, %v3237_v60  ;;  %v3808_v60 = vld [vmem:[#allocation8 + $0x68] sm:$0xff]  }
 0x1c5   : > { %v1705_v62 = vpop.f32.mrf.mxu1  ;;  %v3809_v61 = vld [vmem:[#allocation8 + $0x28] sm:$0xff]  }
 0x1c6   : > { %v1627_v30 = vadd.f32 %v3239_v24, %v1586_v27 }
 0x1c7   : > { %v3339_v63 = vpop.f32.mrf.mxu1 }
 0x1c8   : > { %v3837_v1 = vpop.eup %3836  ;;  %v3811_v63 = vld [vmem:[#allocation8 + $0x20] sm:$0xff]  }
 0x1c9   : > { %v1708_v0 = vpop.f32.mrf.mxu1 }
 0x1ca   : > { %v3839_v51 = vpop.eup %3838 }
 0x1cb   : > { %v3340_v2 = vpop.f32.mrf.mxu1 }
 0x1cc   : > { %v3841_v3 = vpop.eup %3840  ;;  %v3814_v2 = vld [vmem:[#allocation8 + $0x50] sm:$0xff]  }
 0x1cd   : > { %v3843_v4 = vpop.eup %3842  ;;  %v1719_v7 = vpack.c.bf16 %v3841_v3, %v3837_v1  ;;  %v3813_v1 = vld [vmem:[#allocation8 + $0x18] sm:$0xff]   ;;  %v3816_v3 = vld [vmem:[#allocation8 + $0x48] sm:$0xff]  }
 0x1ce   : > { %v4350_v9 = vpack.c.bf16 %v3839_v51, %v3843_v4  ;;  %v3815_v51 = vld [vmem:[#allocation8 + $0x10] sm:$0xff]   ;;  %v3817_v4 = vld [vmem:[#allocation8 + $0x8] sm:$0xff]  }
 0x1cf   : > { %2233 = vmatprep.mubr.bf16.mxu1 %v1719_v7 }
 0x1d0   : > { %2234 = vmatmul.mubr.bf16.vlgmr.msra.gmra.mxu1 %v4350_v9 }
 0x1d1   : > { %3342 = vmatpush3.bf16.msra.mxu1 %v3759_v8  ;;  %3357 = vmatprep.mubr.msk.bf16.mxu1 %vm4091_vm1, %v4090_v21  ;;  %v3820_v8 = vld [vmem:[#allocation8 + $0xb8] sm:$0xff]  }
 0x1d2   : > { %3343 = vmatprep.subr.bf16.mxu1 %v4090_v21 }
 0x1d4   : > { %v3256_v16 = vpop.f32.mrf.mxu0 }
 0x1d5   : > { %3344 = vmatpush3.bf16.msra.mxu1 %v3763_v13  ;;  %v3824_v13 = vld [vmem:[#allocation8 + $0x98] sm:$0xff]  }
 0x1d6   : > { %v3257_v20 = vpop.f32.mrf.mxu0  ;;  %3345 = vmatprep.subr.bf16.mxu1 %v4090_v21 }
 0x1d7   : > { %v3258_v25 = vadd.f32 %v3257_v20, %v3256_v16  ;;  %v3826_v16 = vld [vmem:[#allocation8 + $0x88] sm:$0xff]  }
 0x1d8   : > { %v3259_v26 = vpop.f32.mrf.mxu0 }
 0x1d9   : > { %v1665_v28 = vadd.f32 %v3258_v25, %v1624_v23  ;;  %3346 = vmatpush3.bf16.msra.mxu1 %v3767_v19 }
 0x1da   : > { %v3260_v5 = vpop.f32.mrf.mxu0  ;;  %3347 = vmatprep.subr.bf16.mxu1 %v4090_v21 }
 0x1db   : > { %v3261_v31 = vadd.f32 %v3260_v5, %v3259_v26  ;;  %v1706_v32 = vadd.f32 %v1705_v62, %v1665_v28  ;;  %v3810_v62 = vld [vmem:[#allocation8 + $0x60] sm:$0xff]  }
 0x1dd   : > { %v1668_v33 = vadd.f32 %v3261_v31, %v1627_v30  ;;  %3348 = vmatpush3.bf16.msra.mxu1 %v3771_v29  ;;  %3844 = vtanh.f32 %v1706_v32 }
 0x1de   : > { %3349 = vmatprep.subr.bf16.mxu1 %v4090_v21 }
 0x1df   : > { %v1709_v35 = vadd.f32 %v1708_v0, %v1668_v33  ;;  %v3812_v0 = vld [vmem:[#allocation8 + $0x58] sm:$0xff]  }
 0x1e1   : > { %3846 = vtanh.f32 %v1709_v35  ;;  %3350 = vmatpush3.bf16.msra.mxu1 %v3775_v34 }
 0x1e2   : > { %3351 = vmatprep.subr.bf16.mxu1 %v4090_v21 }
 0x1e5   : > { %3352 = vmatpush3.bf16.msra.mxu1 %v3779_v36 }
 0x1e6   : > { %3353 = vmatprep.subr.bf16.mxu1 %v4090_v21 }
 0x1e9   : > { %3354 = vmatpush3.bf16.msra.mxu1 %v3783_v37 }
 0x1ea   : > { %3355 = vmatprep.subr.bf16.mxu1 %v4090_v21  ;;  %v3845_v14 = vpop.eup %3844 }
 0x1ed   : > { %3356 = vmatpush3.bf16.msra.mxu1 %v3787_v38 }
 0x1ee   : > { %v3847_v39 = vpop.eup %3846  ;;  %3361 = vmatprep.subr.bf16.mxu1 %v4090_v21 }
 0x1ef   : > { %v1720_v41 = vpack.c.bf16 %v3847_v39, %v3845_v14 }
 0x1f1   : > { %2277 = vmatmul.mubr.bf16.vlgmr.msra.gmra.mxu0 %v1720_v41  ;;  %3358 = vmatmul.mubr.bf16.vlgmr.msra.gmra.mxu1 %v1720_v41 }
 0x1f2   : > { %3265 = vmatpush3.bf16.msra.mxu0 %v3789_v40  ;;  %2319 = vmatprep.mubr.bf16.mxu0 %v1719_v7  ;;  %v3819_v7 = vld [vmem:[#allocation8] sm:$0xff]  }
 0x1f3   : > { %3266 = vmatprep.subr.bf16.mxu0 %v3790_v42  ;;  %3377 = vmatprep.mubr.msk.bf16.mxu1 %vm4091_vm1, %v4090_v21 }
 0x1f4   : > { %3362 = vmatpush3.bf16.msra.mxu1 %v3820_v8 }
 0x1f5   : > { %3363 = vmatprep.subr.bf16.mxu1 %v4090_v21 }
 0x1f6   : > { %3267 = vmatpush3.bf16.msra.mxu0 %v3791_v43 }
 0x1f7   : > { %3268 = vmatprep.subr.bf16.mxu0 %v3792_v44 }
 0x1fa   : > { %3269 = vmatpush3.bf16.msra.mxu0 %v3793_v45 }
 0x1fb   : > { %3270 = vmatprep.subr.bf16.mxu0 %v3794_v46 }
 0x1fe   : > { %3271 = vmatpush3.bf16.msra.mxu0 %v3795_v47 }
 0x1ff   : > { %3272 = vmatprep.subr.bf16.mxu0 %v3796_v48 }
 0x202   : > { %3273 = vmatpush3.bf16.msra.mxu0 %v3797_v49 }
 0x203   : > { %3274 = vmatprep.subr.bf16.mxu0 %v3798_v50 }
 0x206   : > { %3275 = vmatpush3.bf16.msra.mxu0 %v3799_v11  ;;  %v3828_v11 = vld [vmem:[#allocation10 + $0x38] sm:$0xff]  }
 0x207   : > { %3276 = vmatprep.subr.bf16.mxu0 %v3800_v52  ;;  %v3829_v52 = vld [vmem:[#allocation10 + $0x30] sm:$0xff]  }
 0x20a   : > { %3277 = vmatpush3.bf16.msra.mxu0 %v3801_v53  ;;  %v3830_v53 = vld [vmem:[#allocation10 + $0x28] sm:$0xff]  }
 0x20b   : > { %3278 = vmatprep.subr.bf16.mxu0 %v3802_v54  ;;  %v3831_v54 = vld [vmem:[#allocation10 + $0x20] sm:$0xff]  }
 0x20e   : > { %3279 = vmatpush3.bf16.msra.mxu0 %v3803_v55  ;;  %v3832_v55 = vld [vmem:[#allocation10 + $0x18] sm:$0xff]  }
 0x20f   : > { %3295 = vmatprep.subr.bf16.mxu0 %v3804_v56  ;;  %v3833_v56 = vld [vmem:[#allocation10 + $0x10] sm:$0xff]  }
 0x211   : > { %2320 = vmatmul.mubr.bf16.vlgmr.msra.gmra.mxu0 %v4350_v9  ;;  %v3821_v9 = vld [vmem:[#allocation8 + $0xb0] sm:$0xff]  }
 0x212   : > { %3296 = vmatpush3.bf16.msra.mxu0 %v3805_v57  ;;  %3364 = vmatpush3.bf16.msra.mxu1 %v3821_v9  ;;  %v3834_v57 = vld [vmem:[#allocation10 + $0x8] sm:$0xff]  }
 0x213   : > { %3297 = vmatprep.subr.bf16.mxu0 %v3806_v58  ;;  %3365 = vmatprep.subr.bf16.mxu1 %v4090_v21  ;;  %v3835_v58 = vld [vmem:[#allocation10] sm:$0xff]  }
 0x216   : > { %3298 = vmatpush3.bf16.msra.mxu0 %v3807_v59  ;;  %3366 = vmatpush3.bf16.msra.mxu1 %v3822_v10 }
 0x217   : > { %3299 = vmatprep.subr.bf16.mxu0 %v3808_v60  ;;  %3367 = vmatprep.subr.bf16.mxu1 %v4090_v21 }
 0x21a   : > { %3300 = vmatpush3.bf16.msra.mxu0 %v3809_v61  ;;  %3368 = vmatpush3.bf16.msra.mxu1 %v3823_v12 }
 0x21b   : > { %3301 = vmatprep.subr.bf16.mxu0 %v3810_v62  ;;  %3369 = vmatprep.subr.bf16.mxu1 %v4090_v21 }
 0x21e   : > { %3302 = vmatpush3.bf16.msra.mxu0 %v3811_v63  ;;  %3370 = vmatpush3.bf16.msra.mxu1 %v3824_v13 }
 0x21f   : > { %3303 = vmatprep.subr.bf16.mxu0 %v3812_v0  ;;  %3371 = vmatprep.subr.bf16.mxu1 %v4090_v21 }
 0x222   : > { %3304 = vmatpush3.bf16.msra.mxu0 %v3813_v1  ;;  %3372 = vmatpush3.bf16.msra.mxu1 %v3825_v15 }
 0x223   : > { %3305 = vmatprep.subr.bf16.mxu0 %v3814_v2  ;;  %3373 = vmatprep.subr.bf16.mxu1 %v4090_v21 }
 0x226   : > { %3306 = vmatpush3.bf16.msra.mxu0 %v3815_v51  ;;  %3374 = vmatpush3.bf16.msra.mxu1 %v3826_v16 }
 0x227   : > { %3307 = vmatprep.subr.bf16.mxu0 %v3816_v3  ;;  %3375 = vmatprep.subr.bf16.mxu1 %v4090_v21 }
 0x22a   : > { %3308 = vmatpush3.bf16.msra.mxu0 %v3817_v4  ;;  %3376 = vmatpush3.bf16.msra.mxu1 %v3827_v17 }
 0x22b   : > { %3309 = vmatprep.subr.bf16.mxu0 %v3818_v6 }
 0x22e   : > { %3310 = vmatpush3.bf16.msra.mxu0 %v3819_v7 }
 0x22f   : > { %3381 = vmatprep.subr.bf16.mxu0 %v4090_v21 }
 0x290   : > { %v2235_v18 = vpop.f32.mrf.mxu1 }
 0x292   : > { %v2237_v19 = vpop.f32.mrf.mxu1 }
 0x294   : > { %v2239_v20 = vpop.f32.mrf.mxu1 }
 0x296   : > { %v2241_v23 = vpop.f32.mrf.mxu1 }
 0x2b1   : > { %v2278_v24 = vpop.f32.mrf.mxu0  ;;  %v2362_v25 = vpop.f32.mrf.mxu1 }
 0x2b2   : > { %v2279_v31 = vadd.f32 %v2278_v24, %v2235_v18 }
 0x2b3   : > { %v2280_v26 = vpop.f32.mrf.mxu0  ;;  %v3359_v27 = vpop.f32.mrf.mxu1 }
 0x2b4   : > { %v2281_v28 = vadd.f32 %v2280_v26, %v2237_v19 }
 0x2b5   : > { %v2282_v29 = vpop.f32.mrf.mxu0  ;;  %v2365_v5 = vpop.f32.mrf.mxu1 }
 0x2b6   : > { %v2283_v30 = vadd.f32 %v2282_v29, %v2239_v20  ;;  %3848 = vtanh.f32 %v2281_v28 }
 0x2b7   : > { %v2284_v32 = vpop.f32.mrf.mxu0  ;;  %v3360_v33 = vpop.f32.mrf.mxu1 }
 0x2b8   : > { %v2285_v34 = vadd.f32 %v2284_v32, %v2241_v23  ;;  %3850 = vtanh.f32 %v2283_v30 }
 0x2ba   : > { %3852 = vtanh.f32 %v2285_v34 }
 0x2bb   : > { %3854 = vtanh.f32 %v2279_v31 }
 0x2c3   : > { %v3849_v35 = vpop.eup %3848 }
 0x2c5   : > { %v3851_v36 = vpop.eup %3850 }
 0x2c7   : > { %v3853_v37 = vpop.eup %3852 }
 0x2c8   : > { %v3855_v38 = vpop.eup %3854  ;;  %v2376_v14 = vpack.c.bf16 %v3853_v37, %v3849_v35 }
 0x2c9   : > { %v2375_v39 = vpack.c.bf16 %v3851_v36, %v3855_v38 }
 0x2ca   : > { %2602 = vmatprep.mubr.bf16.mxu0 %v2376_v14 }
 0x2cb   : > { %2603 = vmatmul.mubr.bf16.vlgmr.msra.gmra.mxu0 %v2375_v39 }
 0x2cc   : > { %3397 = vmatprep.mubr.msk.bf16.mxu0 %vm4091_vm1, %v4090_v21  ;;  %3382 = vmatpush3.bf16.msra.mxu0 %v3828_v11 }
 0x2cd   : > { %3383 = vmatprep.subr.bf16.mxu0 %v4090_v21 }
 0x2d0   : > { %3384 = vmatpush3.bf16.msra.mxu0 %v3829_v52 }
 0x2d1   : > { %v3280_v40 = vpop.f32.mrf.mxu0  ;;  %3385 = vmatprep.subr.bf16.mxu0 %v4090_v21 }
 0x2d3   : > { %v3281_v41 = vpop.f32.mrf.mxu0 }
 0x2d4   : > { %v3282_v42 = vadd.f32 %v3281_v41, %v3280_v40  ;;  %3386 = vmatpush3.bf16.msra.mxu0 %v3830_v53 }
 0x2d5   : > { %v3283_v43 = vpop.f32.mrf.mxu0  ;;  %3387 = vmatprep.subr.bf16.mxu0 %v4090_v21 }
 0x2d6   : > { %v2363_v44 = vadd.f32 %v3282_v42, %v2362_v25 }
 0x2d7   : > { %v3284_v45 = vpop.f32.mrf.mxu0 }
 0x2d8   : > { %v3285_v46 = vadd.f32 %v3284_v45, %v3283_v43  ;;  %3856 = vtanh.f32 %v2363_v44  ;;  %3388 = vmatpush3.bf16.msra.mxu0 %v3831_v54 }
 0x2d9   : > { %3389 = vmatprep.subr.bf16.mxu0 %v4090_v21 }
 0x2da   : > { %v2366_v47 = vadd.f32 %v3285_v46, %v2365_v5 }
 0x2dc   : > { %3858 = vtanh.f32 %v2366_v47  ;;  %3390 = vmatpush3.bf16.msra.mxu0 %v3832_v55 }
 0x2dd   : > { %3391 = vmatprep.subr.bf16.mxu0 %v4090_v21 }
 0x2e0   : > { %3392 = vmatpush3.bf16.msra.mxu0 %v3833_v56 }
 0x2e1   : > { %3393 = vmatprep.subr.bf16.mxu0 %v4090_v21 }
 0x2e4   : > { %3394 = vmatpush3.bf16.msra.mxu0 %v3834_v57 }
 0x2e5   : > { %v3857_v48 = vpop.eup %3856  ;;  %3395 = vmatprep.subr.bf16.mxu0 %v4090_v21  ;;  %v2761_v21 = vand.u32 127, %v538_v22 }
 0x2e7   : > { %vm2762_vm2 = vcmp.lt.s32.totalorder %v2761_v21, 10 }
 0x2e8   : > { %3396 = vmatpush3.bf16.msra.mxu0 %v3835_v58 }
 0x2e9   : > { %v3859_v49 = vpop.eup %3858 }
 0x2ea   : > { %v2377_v50 = vpack.c.bf16 %v3859_v49, %v3857_v48 }
 0x2ec   : > { %3378 = vmatmul.mubr.bf16.vlgmr.msra.gmra.mxu1 %v2377_v50 }
 0x38b   : > { %v3311_v59 = vpop.f32.mrf.mxu0 }
 0x38d   : > { %v3312_v60 = vpop.f32.mrf.mxu0 }
 0x38e   : > { %v3313_v62 = vadd.f32 %v3312_v60, %v3311_v59 }
 0x38f   : > { %v3314_v61 = vpop.f32.mrf.mxu0 }
 0x391   : > { %v3315_v63 = vpop.f32.mrf.mxu0 }
 0x392   : > { %v3316_v51 = vadd.f32 %v3315_v63, %v3314_v61 }
 0x3ac   : > { %v2645_v0 = vpop.f32.mrf.mxu1 }
 0x3ad   : > { %v2646_v1 = vadd.f32 %v3313_v62, %v2645_v0 }
 0x3ae   : > { %v3379_v2 = vpop.f32.mrf.mxu1 }
 0x3af   : > { %3860 = vtanh.f32 %v2646_v1 }
 0x3b0   : > { %v2648_v3 = vpop.f32.mrf.mxu1 }
 0x3b1   : > { %v2649_v4 = vadd.f32 %v3316_v51, %v2648_v3 }
 0x3b2   : > { %v3380_v6 = vpop.f32.mrf.mxu1 }
 0x3b3   : > { %3862 = vtanh.f32 %v2649_v4 }
 0x3bc   : > { %v3861_v7 = vpop.eup %3860 }
 0x3c0   : > { %v3863_v8 = vpop.eup %3862 }
 0x3c1   : > { %v2654_v9 = vpack.c.bf16 %v3863_v8, %v3861_v7 }
 0x3c3   : > { %3398 = vmatmul.mubr.bf16.vlgmr.msra.gmra.mxu0 %v2654_v9 }
 0x483   : > { %v2753_v10 = vpop.f32.mrf.mxu0 }
 0x484   : > { %v2763_v12 = vsel %vm2762_vm2, %v2753_v10, -1e+30 }
 0x485   : > { %2765 = vmax.xlane.f32.xlu0 %v2763_v12  ;;  %v3399_v13 = vpop.f32.mrf.mxu0 }
 0x487   : > { %v2756_v15 = vpop.f32.mrf.mxu0 }
 0x488   : > { %v2764_v16 = vsel %vm2762_vm2, %v2756_v15, -1e+30 }
 0x489   : > { %2767 = vmax.xlane.f32.xlu0 %v2764_v16  ;;  %v3400_v17 = vpop.f32.mrf.mxu0 }
 0x50e   : > { %v2766_v18 = vpop.xlane.xlu0 %2765 }
 0x50f   : > { %v2769_v19 = vsub.f32 %v2763_v12, %v2766_v18 }
 0x511   : > { %v2771_v20 = vmul.f32 1.442695, %v2769_v19 }
 0x512   : > { %v2768_v23 = vpop.xlane.xlu0 %2767 }
 0x513   : > { %3864 = vpow2.f32 %v2771_v20  ;;  %v2770_v24 = vsub.f32 %v2764_v16, %v2768_v23 }
 0x515   : > { %v2773_v25 = vmul.f32 1.442695, %v2770_v24 }
 0x517   : > { %3866 = vpow2.f32 %v2773_v25 }
 0x520   : > { %v3865_v22 = vpop.eup %3864 }
 0x521   : > { %2775 = vadd.xlane.f32.xlu1 %v3865_v22 }
 0x524   : > { %v3867_v26 = vpop.eup %3866 }
 0x525   : > { %2777 = vadd.xlane.f32.xlu1 %v3867_v26 }
 0x5aa   : > { %v2776_v27 = vpop.xlane.xlu1 %2775 }
 0x5ab   : > { %3868 = vlog2.f32 %v2776_v27 }
 0x5ae   : > { %v2778_v28 = vpop.xlane.xlu1 %2777 }
 0x5af   : > { %3870 = vlog2.f32 %v2778_v28 }
 0x5b8   : > { %v3869_v29 = vpop.eup %3868 }
 0x5b9   : > { %v2780_v5 = vmul.f32 0.6931472, %v3869_v29 }
 0x5bb   : > { %v2783_v30 = vadd.f32 %v2780_v5, %v2766_v18 }
 0x5bc   : > { %v3871_v31 = vpop.eup %3870 }
 0x5bd   : > { %v2785_v32 = vsub.f32 %v2763_v12, %v2783_v30  ;;  %v2782_v33 = vmul.f32 0.6931472, %v3871_v31 }
 0x5bf   : > { %2787 = vst [vmem:[%s328_s15] sm:$0xff] %v2785_v32  ;;  %v2784_v34 = vadd.f32 %v2782_v33, %v2768_v23 }
 0x5c1   : > { %v2786_v35 = vsub.f32 %v2764_v16, %v2784_v34 }
 0x5c3   : > { %2788 = vst [vmem:[%s328_s15 + $0x8] sm:$0xff] %v2786_v35 }
 0x5c4   : > { %4017 = shalt.err (!%p4014_p3)
}
 0x5c5   : > { %s4018_s30 = scalar_lea.hbm %s4389_s8, 256  ;;  %s4022_s18 = scalar_lea.hbm %s4440_s6, 512 }
 0x5c6   : > { %p4019_p5 = scmp.ne.s32.totalorder %s4389_s8, %s4018_s30  ;;  %p4023_p8 = scmp.lt.s32.totalorder %s4389_s8, %s4440_s6 }
 0x5c7   : > { %p4024_p13 = scmp.lt.s32.totalorder %s4022_s18, %s4018_s30 }
 0x5c8   : > { %p4020_p4 = pnand %p4019_p5, %p4458_p2 }
 0x5c9   : > { %p4025_p11 = por %p4024_p13, %p4023_p8 }
 0x5ca   : > { %p4021_p6 = pneg %p4020_p4 }
 0x5cc   : > { %p4026_p1 = pnand %p4025_p11, %p4021_p6 }
 0x5ce   : > { %4029 = shalt.err (!%p4026_p1)
}
 0x5cf   : > { %s4093_s7 = smov 128   ;;  %s4094_s14 = smov 8  }
 0x5d0   : > { %3422 = dma.vmem_to_hbm [thread:$0]  (%p4458_p2), %s4391_s16, 256, %s4389_s8, %s2790_s19, %s4093_s7, %s4093_s7, %s4094_s14  }
 0x5d1 PF: > { %s2818_s13 = sand.u32 1, %s4064_s21   ;;  %p4459_p12 = scmp.ne.s32.totalorder %s4446_s28, 0 }
 0x5d2   : > { %p4460_p7 = scmp.ge.s32.totalorder %s4076_s24, 2  ;;  %s2819_s25 = scalar_lea.sflag [#allocation4], %s2818_s13 }
 0x5d4   : > { %p3442_p9 = pnand %p4460_p7, %p4459_p12 }
 0x5d6   : > { %p3443_p0 = pneg %p3442_p9 }
 0x5d8   : > { %4059 = dma.done.wait (%p3443_p0), %s2819_s25, 256  }
 0x5d9   : > { %4061 = vsyncadd (%p3443_p0), %s2819_s25, 4294967040  ;;  %p21_p10 = scmp.ge.s32.totalorder %s4230_s12, 4   ;;  %s4461_s21 = smov %s4068_s22 }
 0x5da   : > { %s4462_s22 = smov %s4072_s23  ;;  %s4463_s23 = smov %s4239_s20 }
 0x5db   : > { %s4464_s24 = smov %s4230_s12  ;;  %23 = sbr.rel (!%p21_p10) target bundleno = 7 (0x7), region = 105 }
 0x5e0   :  { %2824 = vsyncpa [#allocation3], 1 }
 0x5e1   :  { %2826 = vsyncpa [#allocation3 + $0x1], 1 }
 0x5e2   :  { %2827 = vsyncpa [#allocation6], 1 }
 0x5e3   :  { %2828 = vsyncpa [#allocation9], 1 }
 0x5e4   :  { %2829 = vsyncpa [#allocation4], 1 }
 0x5e5   :  { %2831 = vsyncpa [#allocation4 + $0x1], 1 }

</bundles_post_ra>
